<compile_context>
chip_gen: v5e
topology: v5e:2x2
jax: 0.10.0
libtpu: 0.0.40
codegen_flags: <defaults>
</compile_context>

<pallas_src>
import functools

import numpy as np

import jax
import jax.numpy as jnp
from jax import lax
from jax.experimental import pallas as pl
from jax.experimental.pallas import tpu as pltpu


def _round_up(x, m):
    return ((x + m - 1) // m) * m


def _pad2d(x, rows, cols):
    pr, pc = rows - x.shape[0], cols - x.shape[1]
    if pr == 0 and pc == 0:
        return x
    return jnp.pad(x, ((0, pr), (0, pc)))


# ----------------------------------------------------------------------------
# Pallas kernel: the whole D-MPNN forward (message passing + readout).
# Everything is VMEM-resident; grid = () (single program).
# ----------------------------------------------------------------------------
def _dmpnn_kernel(
    node_ref, edge_ref, src_col_ref, dst_row_ref, bat_row_ref,
    wiv_ref, wie_ref, wm_ref, wav_ref, wah_ref, ba_ref,
    gamma_ref, beta_ref, wr1_ref, br1_ref, wr2_ref, br2_ref,
    out_ref,
    *, T: int, compute_dtype,
):
    f32 = jnp.float32
    cd = compute_dtype

    node = node_ref[...].astype(cd)       # (N, d_v)
    edge = edge_ref[...].astype(cd)       # (E, d_e)
    src_c = src_col_ref[...]              # (E, 1) int32
    dst_r = dst_row_ref[...]              # (1, E) int32   dst[e] = src[rev[e]]
    bat_r = bat_row_ref[...]              # (1, N) int32

    E = edge.shape[0]
    N = node.shape[0]
    G = out_ref.shape[0]

    # One-hot gather/scatter matrices built directly from iota compares
    # (no transposes anywhere).  0/1 entries are exact in bf16.
    #   g_src   (E, N): gather node rows to edges (row e picks node src[e]).
    #   g_dst_t (N, E): scatter/segment-sum edge rows over dst[e].
    #   g_bat_t (G, N): scatter/segment-sum node rows over graph id.
    g_src = (src_c == lax.broadcasted_iota(jnp.int32, (E, N), 1)).astype(cd)
    g_dst_t = (dst_r == lax.broadcasted_iota(jnp.int32, (N, E), 0)).astype(cd)
    g_bat_t = (bat_r == lax.broadcasted_iota(jnp.int32, (G, N), 0)).astype(cd)

    # h0 = W_i(cat(node[src], edge)): transform the N node rows once, then
    # gather to edges (algebraically identical, avoids an E-row K=d_v matmul).
    node_w = jnp.dot(node, wiv_ref[...].astype(cd), preferred_element_type=f32)   # (N, d_hp)
    h0 = (jnp.dot(g_src, node_w.astype(cd), preferred_element_type=f32)
          + jnp.dot(edge, wie_ref[...].astype(cd), preferred_element_type=f32))   # (E, d_hp)
    h = jnp.maximum(h0, 0.0)

    wm = wm_ref[...].astype(cd)

    # Edges were pre-ordered so rev(2i) = 2i+1 and rev(2i+1) = 2i: h[rev] is a
    # swap of adjacent rows (two sublane rolls + parity select on a tiny
    # (E, 1) mask).  With the dst-based scatter below this sits OFF the
    # MXU-feeding path (only feeds the '- h_rev' subtract).
    is_even = (lax.broadcasted_iota(jnp.int32, (E, 1), 0) & 1) == 0

    def pair_swap(x):
        return jnp.where(is_even, jnp.roll(x, -1, axis=0), jnp.roll(x, 1, axis=0))

    def step(_, h):
        h_c = h.astype(cd)                                                  # single cast of h
        # segment-sum over dst of h  ==  segment-sum over src of h[rev]
        sum_per_node = jnp.dot(g_dst_t, h_c, preferred_element_type=f32)    # (N, d_hp)
        gathered = jnp.dot(g_src, sum_per_node.astype(cd),
                           preferred_element_type=f32)                      # (E, d_hp)
        msg = gathered - pair_swap(h)                                       # (E, d_hp)
        return jnp.maximum(
            h0 + jnp.dot(msg.astype(cd), wm, preferred_element_type=f32), 0.0)

    # T is a small static constant: fully unroll for cross-iteration overlap.
    h = lax.fori_loop(0, T, step, h, unroll=True)

    # Node readout: m_v = segment-sum of h over src == segment-sum of h[rev]
    # over dst; h_v = relu(W_a([x, m_v]) + b).
    m_v = jnp.dot(g_dst_t, pair_swap(h).astype(cd), preferred_element_type=f32)   # (N, d_hp)
    h_v = jnp.maximum(
        jnp.dot(node, wav_ref[...].astype(cd), preferred_element_type=f32)
        + jnp.dot(m_v.astype(cd), wah_ref[...].astype(cd), preferred_element_type=f32)
        + ba_ref[...],
        0.0,
    )                                                                               # (N, d_hp)

    # Graph pooling: segment-sum of h_v over batch ids.
    h_graph = jnp.dot(g_bat_t, h_v.astype(cd), preferred_element_type=f32)          # (G, d_hp)

    # BatchNorm1d in training mode (batch statistics, biased variance), affine.
    mean = jnp.mean(h_graph, axis=0, keepdims=True)
    var = jnp.mean((h_graph - mean) ** 2, axis=0, keepdims=True)
    hg = (h_graph - mean) * lax.rsqrt(var + 1e-5)
    hg = hg * gamma_ref[...] + beta_ref[...]

    # Readout: Linear -> ReLU -> Dropout(p=0, no-op) -> Linear (lane-padded out).
    r = jnp.maximum(
        jnp.dot(hg.astype(cd), wr1_ref[...].astype(cd), preferred_element_type=f32)
        + br1_ref[...],
        0.0,
    )
    out = (jnp.dot(r.astype(cd), wr2_ref[...].astype(cd), preferred_element_type=f32)
           + br2_ref[...])
    out_ref[...] = out.astype(out_ref.dtype)


# ----------------------------------------------------------------------------
# Wrapper: edge canonicalization + lane padding + single pallas_call.
# ----------------------------------------------------------------------------
def dmpnn_forward(node_feats, edge_feats, src, rev, batch, params, *,
                  T, num_graphs, use_bf16=True, validate=True):
    N, d_v = node_feats.shape
    E, d_e = edge_feats.shape
    d_h = params["wm"].shape[0]
    output_dim = params["wr2"].shape[1]
    # NOTE: if d_h were tunable, padding to 256 on v6e/v7x (2x256^2 MXU) vs
    # 128 on v5e would fill the MXU; with d_h=32 we pad minimally to 128.
    d_hp = _round_up(d_h, 128)
    out_p = _round_up(output_dim, 128)

    src = src.astype(jnp.int32)
    rev = rev.astype(jnp.int32)

    if validate:
        # The in-kernel parity pair-swap relies on rev being a fixed-point-free
        # involution (every undirected bond contributes exactly two directed
        # edges) and on E being even.  (Disable under jit.)
        rev_host = np.asarray(jax.device_get(rev))
        idx = np.arange(E)
        assert E % 2 == 0, "DMPNN kernel requires an even number of directed edges"
        assert np.all(rev_host[rev_host] == idx) and np.all(rev_host != idx), \
            "rev must be a fixed-point-free involution"

    # Re-order the directed edges so reverse pairs are adjacent (2i <-> 2i+1).
    # DMPNN's output is invariant to edge ordering (all edge quantities are
    # only ever segment-summed), so this is exact.  It lets the kernel
    # implement h[rev] as a pair swap instead of an (E, E) one-hot matmul.
    e_idx = jnp.arange(E, dtype=jnp.int32)
    pair_key = jnp.minimum(e_idx, rev) * 2 + (e_idx > rev).astype(jnp.int32)
    order = jnp.argsort(pair_key)
    src_p = src[order]
    dst_p = src[rev][order]          # dst[e] = src[rev[e]], re-ordered consistently
    edge_p = edge_feats[order]

    src_col = src_p.reshape(E, 1)
    dst_row = dst_p.reshape(1, E)
    bat_row = batch.astype(jnp.int32).reshape(1, N)

    # Lane-pad hidden width (and readout output width) to multiples of 128.
    wiv = _pad2d(params["wiv"], d_v, d_hp)
    wie = _pad2d(params["wie"], d_e, d_hp)
    wm = _pad2d(params["wm"], d_hp, d_hp)
    wav = _pad2d(params["wav"], d_v, d_hp)
    wah = _pad2d(params["wah"], d_hp, d_hp)
    ba = _pad2d(params["ba"], 1, d_hp)
    gamma = _pad2d(params["gamma"], 1, d_hp)
    beta = _pad2d(params["beta"], 1, d_hp)
    wr1 = _pad2d(params["wr1"], d_hp, d_hp)
    br1 = _pad2d(params["br1"], 1, d_hp)
    wr2 = _pad2d(params["wr2"], d_hp, out_p)
    br2 = _pad2d(params["br2"], 1, out_p)

    inputs = (
        node_feats, edge_p, src_col, dst_row, bat_row,
        wiv, wie, wm, wav, wah, ba, gamma, beta, wr1, br1, wr2, br2,
    )

    # Advisory cost estimate for XLA's scheduler around the custom call.
    flops = 2 * (
        N * d_v * d_hp + E * d_e * d_hp + E * N * d_hp          # input transform
        + T * (2 * E * N * d_hp + E * d_hp * d_hp)              # message passing
        + E * N * d_hp + N * (d_v + d_hp) * d_hp                # node readout
        + num_graphs * N * d_hp                                 # graph pooling
        + num_graphs * (d_hp * d_hp + d_hp * out_p)             # graph readout
    )
    bytes_accessed = int(sum(x.size * x.dtype.itemsize for x in inputs)
                         + num_graphs * out_p * 4)

    # VMEM budget derived from the actual chip, with headroom for compiler
    # scratch (≈48 MiB on v7x's 64 MiB/TC, ≈96 MiB on v5e/v6e's 128 MiB/TC).
    try:
        vmem_cap = int(pltpu.get_tpu_info().vmem_capacity_bytes)
    except Exception:  # pragma: no cover - conservative fallback
        vmem_cap = 64 * 1024 * 1024
    vmem_limit = max(32 * 1024 * 1024,
                     min(int(vmem_cap * 3 // 4), vmem_cap - 8 * 1024 * 1024))

    vmem_spec = pl.BlockSpec(memory_space=pltpu.MemorySpace.VMEM)
    compute_dtype = jnp.bfloat16 if use_bf16 else jnp.float32

    out = pl.pallas_call(
        functools.partial(_dmpnn_kernel, T=T, compute_dtype=compute_dtype),
        out_shape=jax.ShapeDtypeStruct((num_graphs, out_p), jnp.float32),
        in_specs=[vmem_spec] * len(inputs),
        out_specs=vmem_spec,
        compiler_params=pltpu.CompilerParams(vmem_limit_bytes=vmem_limit),
        cost_estimate=pl.CostEstimate(
            flops=int(flops), transcendentals=int(d_hp),
            bytes_accessed=bytes_accessed),
    )(*inputs)
    return out[:, :output_dim]


# ----------------------------------------------------------------------------
# Pure-JAX reference (for a silent correctness check).
# ----------------------------------------------------------------------------
def dmpnn_reference(node_feats, edge_feats, src, rev, batch, params, *, T, num_graphs):
    N = node_feats.shape[0]
    x_src = node_feats[src]
    h0 = x_src @ params["wiv"] + edge_feats @ params["wie"]
    h = jnp.maximum(h0, 0.0)
    for _ in range(T):
        h_rev = h[rev]
        sum_per_node = jax.ops.segment_sum(h_rev, src, num_segments=N)
        msg = sum_per_node[src] - h_rev
        h = jnp.maximum(h0 + msg @ params["wm"], 0.0)
    m_v = jax.ops.segment_sum(h, src, num_segments=N)
    h_v = jnp.maximum(node_feats @ params["wav"] + m_v @ params["wah"] + params["ba"], 0.0)
    h_graph = jax.ops.segment_sum(h_v, batch, num_segments=num_graphs)
    mean = jnp.mean(h_graph, axis=0, keepdims=True)
    var = jnp.mean((h_graph - mean) ** 2, axis=0, keepdims=True)
    hg = (h_graph - mean) * lax.rsqrt(var + 1e-5) * params["gamma"] + params["beta"]
    r = jnp.maximum(hg @ params["wr1"] + params["br1"], 0.0)
    return r @ params["wr2"] + params["br2"]


# ----------------------------------------------------------------------------
# Deterministic parameter init + small synthetic graph batch.
# ----------------------------------------------------------------------------
def make_params(key, d_v, d_e, d_h, output_dim):
    ks = jax.random.split(key, 8)
    s = 0.1
    return {
        # W_i (d_h, d_v+d_e) split into node/edge halves, pre-transposed for x @ W
        "wiv": jax.random.normal(ks[0], (d_v, d_h), jnp.float32) * s,
        "wie": jax.random.normal(ks[1], (d_e, d_h), jnp.float32) * s,
        "wm":  jax.random.normal(ks[2], (d_h, d_h), jnp.float32) * s,
        # W_a (d_h, d_v+d_h) split and pre-transposed
        "wav": jax.random.normal(ks[3], (d_v, d_h), jnp.float32) * s,
        "wah": jax.random.normal(ks[4], (d_h, d_h), jnp.float32) * s,
        "ba":  jax.random.normal(ks[5], (1, d_h), jnp.float32) * s,
        # BatchNorm1d affine params (init: gamma=1, beta=0)
        "gamma": jnp.ones((1, d_h), jnp.float32),
        "beta":  jnp.zeros((1, d_h), jnp.float32),
        # readout
        "wr1": jax.random.normal(ks[6], (d_h, d_h), jnp.float32) * s,
        "br1": jnp.zeros((1, d_h), jnp.float32),
        "wr2": jax.random.normal(ks[7], (d_h, output_dim), jnp.float32) * s,
        "br2": jnp.zeros((1, output_dim), jnp.float32),
    }


def build_cycle_batch(sizes):
    """Cycle graph per size; each undirected edge -> two directed edges + rev."""
    src, rev, batch = [], [], []
    offset = 0
    for g, n in enumerate(sizes):
        for i in range(n):
            a = offset + i
            b = offset + (i + 1) % n
            e0 = len(src)
            src += [a, b]
            rev += [e0 + 1, e0]
        batch += [g] * n
        offset += n
    return (jnp.array(src, jnp.int32), jnp.array(rev, jnp.int32),
            jnp.array(batch, jnp.int32), offset)


if __name__ == "__main__":
    d_v, d_e, d_h, T, output_dim = 8, 4, 32, 5, 1

    # Four cycle graphs of different sizes: 18 nodes, 36 directed edges, 4 graphs.
    src, rev, batch, N = build_cycle_batch([3, 4, 5, 6])
    E = int(src.shape[0])
    G = int(batch[-1]) + 1

    key = jax.random.PRNGKey(0)
    k_node, k_edge, k_par, k_perm = jax.random.split(key, 4)

    node_feats = jax.random.normal(k_node, (N, d_v), jnp.float32)
    edge_feats = jax.random.normal(k_edge, (E, d_e), jnp.float32)

    # Shuffle the directed-edge ordering to exercise the wrapper's pair
    # canonicalization (rev map is remapped consistently).
    perm = jax.random.permutation(k_perm, E)
    inv = jnp.zeros((E,), jnp.int32).at[perm].set(jnp.arange(E, dtype=jnp.int32))
    src = src[perm]
    edge_feats = edge_feats[perm]
    rev = inv[rev[perm]]

    params = make_params(k_par, d_v, d_e, d_h, output_dim)

    ref = dmpnn_reference(node_feats, edge_feats, src, rev, batch, params,
                          T=T, num_graphs=G)

    # f32 kernel: strict check against the pure-JAX reference.
    out_f32 = dmpnn_forward(node_feats, edge_feats, src, rev, batch, params,
                            T=T, num_graphs=G, use_bf16=False)
    out_f32 = jax.block_until_ready(out_f32)
    assert out_f32.shape == (G, output_dim)
    assert jnp.allclose(out_f32, ref, atol=1e-4, rtol=1e-4)

    # bf16-MXU kernel (default): same logic, reduced operand precision
    # (f32 accumulation), so only a loose tolerance is asserted.
    out_bf16 = dmpnn_forward(node_feats, edge_feats, src, rev, batch, params,
                             T=T, num_graphs=G, use_bf16=True)
    out_bf16 = jax.block_until_ready(out_bf16)
    assert out_bf16.shape == (G, output_dim)
    assert bool(jnp.all(jnp.isfinite(out_bf16)))
    assert float(jnp.max(jnp.abs(out_bf16 - ref))) < 1e-1

    print("KERNEL_OK")
</pallas_src>

<mosaic_0001>
module attributes {stable_mosaic.version = 11 : i64} {
  func.func @_dmpnn_kernel(%arg0: memref<18x8xf32, #tpu.memory_space<vmem>>, %arg1: memref<36x4xf32, #tpu.memory_space<vmem>>, %arg2: memref<36x1xi32, #tpu.memory_space<vmem>>, %arg3: memref<1x36xi32, #tpu.memory_space<vmem>>, %arg4: memref<1x18xi32, #tpu.memory_space<vmem>>, %arg5: memref<8x128xf32, #tpu.memory_space<vmem>>, %arg6: memref<4x128xf32, #tpu.memory_space<vmem>>, %arg7: memref<128x128xf32, #tpu.memory_space<vmem>>, %arg8: memref<8x128xf32, #tpu.memory_space<vmem>>, %arg9: memref<128x128xf32, #tpu.memory_space<vmem>>, %arg10: memref<1x128xf32, #tpu.memory_space<vmem>>, %arg11: memref<1x128xf32, #tpu.memory_space<vmem>>, %arg12: memref<1x128xf32, #tpu.memory_space<vmem>>, %arg13: memref<128x128xf32, #tpu.memory_space<vmem>>, %arg14: memref<1x128xf32, #tpu.memory_space<vmem>>, %arg15: memref<128x128xf32, #tpu.memory_space<vmem>>, %arg16: memref<1x128xf32, #tpu.memory_space<vmem>>, %arg17: memref<4x128xf32, #tpu.memory_space<vmem>>) attributes {dimension_semantics = [], scalar_prefetch = 0 : i64, scratch_operands = 0 : i64, tpu.core_type = #tpu.core_type<tc>} {
    %c0 = arith.constant 0 : index
    %c0_0 = arith.constant 0 : index
    %0 = vector.load %arg0[%c0, %c0_0] : memref<18x8xf32, #tpu.memory_space<vmem>>, vector<18x8xf32>
    %c0_1 = arith.constant 0 : index
    %c0_2 = arith.constant 0 : index
    %1 = vector.load %arg1[%c0_1, %c0_2] : memref<36x4xf32, #tpu.memory_space<vmem>>, vector<36x4xf32>
    %c0_3 = arith.constant 0 : index
    %c0_4 = arith.constant 0 : index
    %2 = vector.load %arg2[%c0_3, %c0_4] : memref<36x1xi32, #tpu.memory_space<vmem>>, vector<36x1xi32>
    %c0_5 = arith.constant 0 : index
    %c0_6 = arith.constant 0 : index
    %3 = vector.load %arg3[%c0_5, %c0_6] : memref<1x36xi32, #tpu.memory_space<vmem>>, vector<1x36xi32>
    %c0_7 = arith.constant 0 : index
    %c0_8 = arith.constant 0 : index
    %4 = vector.load %arg4[%c0_7, %c0_8] : memref<1x18xi32, #tpu.memory_space<vmem>>, vector<1x18xi32>
    %5 = tpu.iota {dimensions = array<i32: 1>} : vector<36x18xi32>
    %6 = vector.broadcast %2 : vector<36x1xi32> to vector<36x18xi32>
    %7 = arith.cmpi eq, %6, %5 : vector<36x18xi32>
    %8 = arith.extui %7 : vector<36x18xi1> to vector<36x18xi32>
    %9 = arith.sitofp %8 : vector<36x18xi32> to vector<36x18xf32>
    %10 = tpu.iota {dimensions = array<i32: 0>} : vector<18x36xi32>
    %11 = vector.broadcast %3 : vector<1x36xi32> to vector<18x36xi32>
    %12 = arith.cmpi eq, %11, %10 : vector<18x36xi32>
    %13 = arith.extui %12 : vector<18x36xi1> to vector<18x36xi32>
    %14 = arith.sitofp %13 : vector<18x36xi32> to vector<18x36xf32>
    %15 = tpu.iota {dimensions = array<i32: 0>} : vector<4x18xi32>
    %16 = vector.broadcast %4 : vector<1x18xi32> to vector<4x18xi32>
    %17 = arith.cmpi eq, %16, %15 : vector<4x18xi32>
    %18 = arith.extui %17 : vector<4x18xi1> to vector<4x18xi32>
    %19 = arith.sitofp %18 : vector<4x18xi32> to vector<4x18xf32>
    %c0_9 = arith.constant 0 : index
    %c0_10 = arith.constant 0 : index
    %20 = vector.load %arg5[%c0_9, %c0_10] : memref<8x128xf32, #tpu.memory_space<vmem>>, vector<8x128xf32>
    %cst = arith.constant dense<0.000000e+00> : vector<18x128xf32>
    %21 = tpu.matmul %0, %20, %cst {dimension_numbers = #tpu.dot_dimension_numbers<[1], [0], [0], [1], [0, 0, 1, 1], [], []>} : vector<18x8xf32>, vector<8x128xf32>, vector<18x128xf32> -> vector<18x128xf32>
    %cst_11 = arith.constant dense<0.000000e+00> : vector<36x128xf32>
    %22 = tpu.matmul %9, %21, %cst_11 {dimension_numbers = #tpu.dot_dimension_numbers<[1], [0], [0], [1], [0, 0, 1, 1], [], []>} : vector<36x18xf32>, vector<18x128xf32>, vector<36x128xf32> -> vector<36x128xf32>
    %c0_12 = arith.constant 0 : index
    %c0_13 = arith.constant 0 : index
    %23 = vector.load %arg6[%c0_12, %c0_13] : memref<4x128xf32, #tpu.memory_space<vmem>>, vector<4x128xf32>
    %cst_14 = arith.constant dense<0.000000e+00> : vector<36x128xf32>
    %24 = tpu.matmul %1, %23, %cst_14 {dimension_numbers = #tpu.dot_dimension_numbers<[1], [0], [0], [1], [0, 0, 1, 1], [], []>} : vector<36x4xf32>, vector<4x128xf32>, vector<36x128xf32> -> vector<36x128xf32>
    %25 = arith.addf %22, %24 : vector<36x128xf32>
    %cst_15 = arith.constant 0.000000e+00 : f32
    %26 = vector.broadcast %cst_15 : f32 to vector<36x128xf32>
    %27 = arith.maximumf %25, %26 : vector<36x128xf32>
    %c0_16 = arith.constant 0 : index
    %c0_17 = arith.constant 0 : index
    %28 = vector.load %arg7[%c0_16, %c0_17] : memref<128x128xf32, #tpu.memory_space<vmem>>, vector<128x128xf32>
    %29 = tpu.iota {dimensions = array<i32: 0>} : vector<36x1xi32>
    %c1_i32 = arith.constant 1 : i32
    %30 = vector.broadcast %c1_i32 : i32 to vector<36x1xi32>
    %31 = arith.andi %29, %30 : vector<36x1xi32>
    %c0_i32 = arith.constant 0 : i32
    %32 = vector.broadcast %c0_i32 : i32 to vector<36x1xi32>
    %33 = arith.cmpi eq, %31, %32 : vector<36x1xi32>
    %c0_i32_18 = arith.constant 0 : i32
    %cst_19 = arith.constant dense<0.000000e+00> : vector<18x128xf32>
    %34 = tpu.matmul %14, %27, %cst_19 {dimension_numbers = #tpu.dot_dimension_numbers<[1], [0], [0], [1], [0, 0, 1, 1], [], []>} : vector<18x36xf32>, vector<36x128xf32>, vector<18x128xf32> -> vector<18x128xf32>
    %cst_20 = arith.constant dense<0.000000e+00> : vector<36x128xf32>
    %35 = tpu.matmul %9, %34, %cst_20 {dimension_numbers = #tpu.dot_dimension_numbers<[1], [0], [0], [1], [0, 0, 1, 1], [], []>} : vector<36x18xf32>, vector<18x128xf32>, vector<36x128xf32> -> vector<36x128xf32>
    %36 = vector.extract_strided_slice %27 {offsets = [1, 0], sizes = [35, 128], strides = [1, 1]} : vector<36x128xf32> to vector<35x128xf32>
    %37 = vector.extract_strided_slice %27 {offsets = [0, 0], sizes = [1, 128], strides = [1, 1]} : vector<36x128xf32> to vector<1x128xf32>
    %38 = tpu.concatenate %36, %37 in 0 : vector<35x128xf32>, vector<1x128xf32> -> vector<36x128xf32>
    %39 = vector.extract_strided_slice %27 {offsets = [35, 0], sizes = [1, 128], strides = [1, 1]} : vector<36x128xf32> to vector<1x128xf32>
    %40 = vector.extract_strided_slice %27 {offsets = [0, 0], sizes = [35, 128], strides = [1, 1]} : vector<36x128xf32> to vector<35x128xf32>
    %41 = tpu.concatenate %39, %40 in 0 : vector<1x128xf32>, vector<35x128xf32> -> vector<36x128xf32>
    %42 = vector.shape_cast %33 : vector<36x1xi1> to vector<36x1xi1>
    %43 = vector.broadcast %42 : vector<36x1xi1> to vector<36x128xi1>
    %44 = arith.select %43, %38, %41 : vector<36x128xi1>, vector<36x128xf32>
    %45 = arith.subf %35, %44 : vector<36x128xf32>
    %cst_21 = arith.constant dense<0.000000e+00> : vector<36x128xf32>
    %46 = tpu.matmul %45, %28, %cst_21 {dimension_numbers = #tpu.dot_dimension_numbers<[1], [0], [0], [1], [0, 0, 1, 1], [], []>} : vector<36x128xf32>, vector<128x128xf32>, vector<36x128xf32> -> vector<36x128xf32>
    %47 = arith.addf %25, %46 : vector<36x128xf32>
    %cst_22 = arith.constant 0.000000e+00 : f32
    %48 = vector.broadcast %cst_22 : f32 to vector<36x128xf32>
    %49 = arith.maximumf %47, %48 : vector<36x128xf32>
    %c1_i32_23 = arith.constant 1 : i32
    %cst_24 = arith.constant dense<0.000000e+00> : vector<18x128xf32>
    %50 = tpu.matmul %14, %49, %cst_24 {dimension_numbers = #tpu.dot_dimension_numbers<[1], [0], [0], [1], [0, 0, 1, 1], [], []>} : vector<18x36xf32>, vector<36x128xf32>, vector<18x128xf32> -> vector<18x128xf32>
    %cst_25 = arith.constant dense<0.000000e+00> : vector<36x128xf32>
    %51 = tpu.matmul %9, %50, %cst_25 {dimension_numbers = #tpu.dot_dimension_numbers<[1], [0], [0], [1], [0, 0, 1, 1], [], []>} : vector<36x18xf32>, vector<18x128xf32>, vector<36x128xf32> -> vector<36x128xf32>
    %52 = vector.extract_strided_slice %49 {offsets = [1, 0], sizes = [35, 128], strides = [1, 1]} : vector<36x128xf32> to vector<35x128xf32>
    %53 = vector.extract_strided_slice %49 {offsets = [0, 0], sizes = [1, 128], strides = [1, 1]} : vector<36x128xf32> to vector<1x128xf32>
    %54 = tpu.concatenate %52, %53 in 0 : vector<35x128xf32>, vector<1x128xf32> -> vector<36x128xf32>
    %55 = vector.extract_strided_slice %49 {offsets = [35, 0], sizes = [1, 128], strides = [1, 1]} : vector<36x128xf32> to vector<1x128xf32>
    %56 = vector.extract_strided_slice %49 {offsets = [0, 0], sizes = [35, 128], strides = [1, 1]} : vector<36x128xf32> to vector<35x128xf32>
    %57 = tpu.concatenate %55, %56 in 0 : vector<1x128xf32>, vector<35x128xf32> -> vector<36x128xf32>
    %58 = vector.shape_cast %33 : vector<36x1xi1> to vector<36x1xi1>
    %59 = vector.broadcast %58 : vector<36x1xi1> to vector<36x128xi1>
    %60 = arith.select %59, %54, %57 : vector<36x128xi1>, vector<36x128xf32>
    %61 = arith.subf %51, %60 : vector<36x128xf32>
    %cst_26 = arith.constant dense<0.000000e+00> : vector<36x128xf32>
    %62 = tpu.matmul %61, %28, %cst_26 {dimension_numbers = #tpu.dot_dimension_numbers<[1], [0], [0], [1], [0, 0, 1, 1], [], []>} : vector<36x128xf32>, vector<128x128xf32>, vector<36x128xf32> -> vector<36x128xf32>
    %63 = arith.addf %25, %62 : vector<36x128xf32>
    %cst_27 = arith.constant 0.000000e+00 : f32
    %64 = vector.broadcast %cst_27 : f32 to vector<36x128xf32>
    %65 = arith.maximumf %63, %64 : vector<36x128xf32>
    %c2_i32 = arith.constant 2 : i32
    %cst_28 = arith.constant dense<0.000000e+00> : vector<18x128xf32>
    %66 = tpu.matmul %14, %65, %cst_28 {dimension_numbers = #tpu.dot_dimension_numbers<[1], [0], [0], [1], [0, 0, 1, 1], [], []>} : vector<18x36xf32>, vector<36x128xf32>, vector<18x128xf32> -> vector<18x128xf32>
    %cst_29 = arith.constant dense<0.000000e+00> : vector<36x128xf32>
    %67 = tpu.matmul %9, %66, %cst_29 {dimension_numbers = #tpu.dot_dimension_numbers<[1], [0], [0], [1], [0, 0, 1, 1], [], []>} : vector<36x18xf32>, vector<18x128xf32>, vector<36x128xf32> -> vector<36x128xf32>
    %68 = vector.extract_strided_slice %65 {offsets = [1, 0], sizes = [35, 128], strides = [1, 1]} : vector<36x128xf32> to vector<35x128xf32>
    %69 = vector.extract_strided_slice %65 {offsets = [0, 0], sizes = [1, 128], strides = [1, 1]} : vector<36x128xf32> to vector<1x128xf32>
    %70 = tpu.concatenate %68, %69 in 0 : vector<35x128xf32>, vector<1x128xf32> -> vector<36x128xf32>
    %71 = vector.extract_strided_slice %65 {offsets = [35, 0], sizes = [1, 128], strides = [1, 1]} : vector<36x128xf32> to vector<1x128xf32>
    %72 = vector.extract_strided_slice %65 {offsets = [0, 0], sizes = [35, 128], strides = [1, 1]} : vector<36x128xf32> to vector<35x128xf32>
    %73 = tpu.concatenate %71, %72 in 0 : vector<1x128xf32>, vector<35x128xf32> -> vector<36x128xf32>
    %74 = vector.shape_cast %33 : vector<36x1xi1> to vector<36x1xi1>
    %75 = vector.broadcast %74 : vector<36x1xi1> to vector<36x128xi1>
    %76 = arith.select %75, %70, %73 : vector<36x128xi1>, vector<36x128xf32>
    %77 = arith.subf %67, %76 : vector<36x128xf32>
    %cst_30 = arith.constant dense<0.000000e+00> : vector<36x128xf32>
    %78 = tpu.matmul %77, %28, %cst_30 {dimension_numbers = #tpu.dot_dimension_numbers<[1], [0], [0], [1], [0, 0, 1, 1], [], []>} : vector<36x128xf32>, vector<128x128xf32>, vector<36x128xf32> -> vector<36x128xf32>
    %79 = arith.addf %25, %78 : vector<36x128xf32>
    %cst_31 = arith.constant 0.000000e+00 : f32
    %80 = vector.broadcast %cst_31 : f32 to vector<36x128xf32>
    %81 = arith.maximumf %79, %80 : vector<36x128xf32>
    %c3_i32 = arith.constant 3 : i32
    %cst_32 = arith.constant dense<0.000000e+00> : vector<18x128xf32>
    %82 = tpu.matmul %14, %81, %cst_32 {dimension_numbers = #tpu.dot_dimension_numbers<[1], [0], [0], [1], [0, 0, 1, 1], [], []>} : vector<18x36xf32>, vector<36x128xf32>, vector<18x128xf32> -> vector<18x128xf32>
    %cst_33 = arith.constant dense<0.000000e+00> : vector<36x128xf32>
    %83 = tpu.matmul %9, %82, %cst_33 {dimension_numbers = #tpu.dot_dimension_numbers<[1], [0], [0], [1], [0, 0, 1, 1], [], []>} : vector<36x18xf32>, vector<18x128xf32>, vector<36x128xf32> -> vector<36x128xf32>
    %84 = vector.extract_strided_slice %81 {offsets = [1, 0], sizes = [35, 128], strides = [1, 1]} : vector<36x128xf32> to vector<35x128xf32>
    %85 = vector.extract_strided_slice %81 {offsets = [0, 0], sizes = [1, 128], strides = [1, 1]} : vector<36x128xf32> to vector<1x128xf32>
    %86 = tpu.concatenate %84, %85 in 0 : vector<35x128xf32>, vector<1x128xf32> -> vector<36x128xf32>
    %87 = vector.extract_strided_slice %81 {offsets = [35, 0], sizes = [1, 128], strides = [1, 1]} : vector<36x128xf32> to vector<1x128xf32>
    %88 = vector.extract_strided_slice %81 {offsets = [0, 0], sizes = [35, 128], strides = [1, 1]} : vector<36x128xf32> to vector<35x128xf32>
    %89 = tpu.concatenate %87, %88 in 0 : vector<1x128xf32>, vector<35x128xf32> -> vector<36x128xf32>
    %90 = vector.shape_cast %33 : vector<36x1xi1> to vector<36x1xi1>
    %91 = vector.broadcast %90 : vector<36x1xi1> to vector<36x128xi1>
    %92 = arith.select %91, %86, %89 : vector<36x128xi1>, vector<36x128xf32>
    %93 = arith.subf %83, %92 : vector<36x128xf32>
    %cst_34 = arith.constant dense<0.000000e+00> : vector<36x128xf32>
    %94 = tpu.matmul %93, %28, %cst_34 {dimension_numbers = #tpu.dot_dimension_numbers<[1], [0], [0], [1], [0, 0, 1, 1], [], []>} : vector<36x128xf32>, vector<128x128xf32>, vector<36x128xf32> -> vector<36x128xf32>
    %95 = arith.addf %25, %94 : vector<36x128xf32>
    %cst_35 = arith.constant 0.000000e+00 : f32
    %96 = vector.broadcast %cst_35 : f32 to vector<36x128xf32>
    %97 = arith.maximumf %95, %96 : vector<36x128xf32>
    %c4_i32 = arith.constant 4 : i32
    %cst_36 = arith.constant dense<0.000000e+00> : vector<18x128xf32>
    %98 = tpu.matmul %14, %97, %cst_36 {dimension_numbers = #tpu.dot_dimension_numbers<[1], [0], [0], [1], [0, 0, 1, 1], [], []>} : vector<18x36xf32>, vector<36x128xf32>, vector<18x128xf32> -> vector<18x128xf32>
    %cst_37 = arith.constant dense<0.000000e+00> : vector<36x128xf32>
    %99 = tpu.matmul %9, %98, %cst_37 {dimension_numbers = #tpu.dot_dimension_numbers<[1], [0], [0], [1], [0, 0, 1, 1], [], []>} : vector<36x18xf32>, vector<18x128xf32>, vector<36x128xf32> -> vector<36x128xf32>
    %100 = vector.extract_strided_slice %97 {offsets = [1, 0], sizes = [35, 128], strides = [1, 1]} : vector<36x128xf32> to vector<35x128xf32>
    %101 = vector.extract_strided_slice %97 {offsets = [0, 0], sizes = [1, 128], strides = [1, 1]} : vector<36x128xf32> to vector<1x128xf32>
    %102 = tpu.concatenate %100, %101 in 0 : vector<35x128xf32>, vector<1x128xf32> -> vector<36x128xf32>
    %103 = vector.extract_strided_slice %97 {offsets = [35, 0], sizes = [1, 128], strides = [1, 1]} : vector<36x128xf32> to vector<1x128xf32>
    %104 = vector.extract_strided_slice %97 {offsets = [0, 0], sizes = [35, 128], strides = [1, 1]} : vector<36x128xf32> to vector<35x128xf32>
    %105 = tpu.concatenate %103, %104 in 0 : vector<1x128xf32>, vector<35x128xf32> -> vector<36x128xf32>
    %106 = vector.shape_cast %33 : vector<36x1xi1> to vector<36x1xi1>
    %107 = vector.broadcast %106 : vector<36x1xi1> to vector<36x128xi1>
    %108 = arith.select %107, %102, %105 : vector<36x128xi1>, vector<36x128xf32>
    %109 = arith.subf %99, %108 : vector<36x128xf32>
    %cst_38 = arith.constant dense<0.000000e+00> : vector<36x128xf32>
    %110 = tpu.matmul %109, %28, %cst_38 {dimension_numbers = #tpu.dot_dimension_numbers<[1], [0], [0], [1], [0, 0, 1, 1], [], []>} : vector<36x128xf32>, vector<128x128xf32>, vector<36x128xf32> -> vector<36x128xf32>
    %111 = arith.addf %25, %110 : vector<36x128xf32>
    %cst_39 = arith.constant 0.000000e+00 : f32
    %112 = vector.broadcast %cst_39 : f32 to vector<36x128xf32>
    %113 = arith.maximumf %111, %112 : vector<36x128xf32>
    %114 = vector.extract_strided_slice %113 {offsets = [1, 0], sizes = [35, 128], strides = [1, 1]} : vector<36x128xf32> to vector<35x128xf32>
    %115 = vector.extract_strided_slice %113 {offsets = [0, 0], sizes = [1, 128], strides = [1, 1]} : vector<36x128xf32> to vector<1x128xf32>
    %116 = tpu.concatenate %114, %115 in 0 : vector<35x128xf32>, vector<1x128xf32> -> vector<36x128xf32>
    %117 = vector.extract_strided_slice %113 {offsets = [35, 0], sizes = [1, 128], strides = [1, 1]} : vector<36x128xf32> to vector<1x128xf32>
    %118 = vector.extract_strided_slice %113 {offsets = [0, 0], sizes = [35, 128], strides = [1, 1]} : vector<36x128xf32> to vector<35x128xf32>
    %119 = tpu.concatenate %117, %118 in 0 : vector<1x128xf32>, vector<35x128xf32> -> vector<36x128xf32>
    %120 = vector.shape_cast %33 : vector<36x1xi1> to vector<36x1xi1>
    %121 = vector.broadcast %120 : vector<36x1xi1> to vector<36x128xi1>
    %122 = arith.select %121, %116, %119 : vector<36x128xi1>, vector<36x128xf32>
    %cst_40 = arith.constant dense<0.000000e+00> : vector<18x128xf32>
    %123 = tpu.matmul %14, %122, %cst_40 {dimension_numbers = #tpu.dot_dimension_numbers<[1], [0], [0], [1], [0, 0, 1, 1], [], []>} : vector<18x36xf32>, vector<36x128xf32>, vector<18x128xf32> -> vector<18x128xf32>
    %c0_41 = arith.constant 0 : index
    %c0_42 = arith.constant 0 : index
    %124 = vector.load %arg8[%c0_41, %c0_42] : memref<8x128xf32, #tpu.memory_space<vmem>>, vector<8x128xf32>
    %cst_43 = arith.constant dense<0.000000e+00> : vector<18x128xf32>
    %125 = tpu.matmul %0, %124, %cst_43 {dimension_numbers = #tpu.dot_dimension_numbers<[1], [0], [0], [1], [0, 0, 1, 1], [], []>} : vector<18x8xf32>, vector<8x128xf32>, vector<18x128xf32> -> vector<18x128xf32>
    %c0_44 = arith.constant 0 : index
    %c0_45 = arith.constant 0 : index
    %126 = vector.load %arg9[%c0_44, %c0_45] : memref<128x128xf32, #tpu.memory_space<vmem>>, vector<128x128xf32>
    %cst_46 = arith.constant dense<0.000000e+00> : vector<18x128xf32>
    %127 = tpu.matmul %123, %126, %cst_46 {dimension_numbers = #tpu.dot_dimension_numbers<[1], [0], [0], [1], [0, 0, 1, 1], [], []>} : vector<18x128xf32>, vector<128x128xf32>, vector<18x128xf32> -> vector<18x128xf32>
    %128 = arith.addf %125, %127 : vector<18x128xf32>
    %c0_47 = arith.constant 0 : index
    %c0_48 = arith.constant 0 : index
    %129 = vector.load %arg10[%c0_47, %c0_48] : memref<1x128xf32, #tpu.memory_space<vmem>>, vector<1x128xf32>
    %130 = vector.broadcast %129 : vector<1x128xf32> to vector<18x128xf32>
    %131 = arith.addf %128, %130 : vector<18x128xf32>
    %cst_49 = arith.constant 0.000000e+00 : f32
    %132 = vector.broadcast %cst_49 : f32 to vector<18x128xf32>
    %133 = arith.maximumf %131, %132 : vector<18x128xf32>
    %cst_50 = arith.constant dense<0.000000e+00> : vector<4x128xf32>
    %134 = tpu.matmul %19, %133, %cst_50 {dimension_numbers = #tpu.dot_dimension_numbers<[1], [0], [0], [1], [0, 0, 1, 1], [], []>} : vector<4x18xf32>, vector<18x128xf32>, vector<4x128xf32> -> vector<4x128xf32>
    %cst_51 = arith.constant dense<0.000000e+00> : vector<128xf32>
    %135 = vector.multi_reduction <add>, %134, %cst_51 [0] : vector<4x128xf32> to vector<128xf32>
    %136 = vector.shape_cast %135 : vector<128xf32> to vector<1x128xf32>
    %cst_52 = arith.constant 4.000000e+00 : f32
    %137 = vector.broadcast %cst_52 : f32 to vector<1x128xf32>
    %138 = arith.divf %136, %137 : vector<1x128xf32>
    %139 = vector.broadcast %138 : vector<1x128xf32> to vector<4x128xf32>
    %140 = arith.subf %134, %139 : vector<4x128xf32>
    %141 = arith.mulf %140, %140 : vector<4x128xf32>
    %cst_53 = arith.constant dense<0.000000e+00> : vector<128xf32>
    %142 = vector.multi_reduction <add>, %141, %cst_53 [0] : vector<4x128xf32> to vector<128xf32>
    %143 = vector.shape_cast %142 : vector<128xf32> to vector<1x128xf32>
    %cst_54 = arith.constant 4.000000e+00 : f32
    %144 = vector.broadcast %cst_54 : f32 to vector<1x128xf32>
    %145 = arith.divf %143, %144 : vector<1x128xf32>
    %146 = vector.broadcast %138 : vector<1x128xf32> to vector<4x128xf32>
    %147 = arith.subf %134, %146 : vector<4x128xf32>
    %cst_55 = arith.constant 9.99999974E-6 : f32
    %148 = vector.broadcast %cst_55 : f32 to vector<1x128xf32>
    %149 = arith.addf %145, %148 : vector<1x128xf32>
    %150 = math.rsqrt %149 : vector<1x128xf32>
    %151 = vector.broadcast %150 : vector<1x128xf32> to vector<4x128xf32>
    %152 = arith.mulf %147, %151 : vector<4x128xf32>
    %c0_56 = arith.constant 0 : index
    %c0_57 = arith.constant 0 : index
    %153 = vector.load %arg11[%c0_56, %c0_57] : memref<1x128xf32, #tpu.memory_space<vmem>>, vector<1x128xf32>
    %154 = vector.broadcast %153 : vector<1x128xf32> to vector<4x128xf32>
    %155 = arith.mulf %152, %154 : vector<4x128xf32>
    %c0_58 = arith.constant 0 : index
    %c0_59 = arith.constant 0 : index
    %156 = vector.load %arg12[%c0_58, %c0_59] : memref<1x128xf32, #tpu.memory_space<vmem>>, vector<1x128xf32>
    %157 = vector.broadcast %156 : vector<1x128xf32> to vector<4x128xf32>
    %158 = arith.addf %155, %157 : vector<4x128xf32>
    %c0_60 = arith.constant 0 : index
    %c0_61 = arith.constant 0 : index
    %159 = vector.load %arg13[%c0_60, %c0_61] : memref<128x128xf32, #tpu.memory_space<vmem>>, vector<128x128xf32>
    %cst_62 = arith.constant dense<0.000000e+00> : vector<4x128xf32>
    %160 = tpu.matmul %158, %159, %cst_62 {dimension_numbers = #tpu.dot_dimension_numbers<[1], [0], [0], [1], [0, 0, 1, 1], [], []>} : vector<4x128xf32>, vector<128x128xf32>, vector<4x128xf32> -> vector<4x128xf32>
    %c0_63 = arith.constant 0 : index
    %c0_64 = arith.constant 0 : index
    %161 = vector.load %arg14[%c0_63, %c0_64] : memref<1x128xf32, #tpu.memory_space<vmem>>, vector<1x128xf32>
    %162 = vector.broadcast %161 : vector<1x128xf32> to vector<4x128xf32>
    %163 = arith.addf %160, %162 : vector<4x128xf32>
    %cst_65 = arith.constant 0.000000e+00 : f32
    %164 = vector.broadcast %cst_65 : f32 to vector<4x128xf32>
    %165 = arith.maximumf %163, %164 : vector<4x128xf32>
    %c0_66 = arith.constant 0 : index
    %c0_67 = arith.constant 0 : index
    %166 = vector.load %arg15[%c0_66, %c0_67] : memref<128x128xf32, #tpu.memory_space<vmem>>, vector<128x128xf32>
    %cst_68 = arith.constant dense<0.000000e+00> : vector<4x128xf32>
    %167 = tpu.matmul %165, %166, %cst_68 {dimension_numbers = #tpu.dot_dimension_numbers<[1], [0], [0], [1], [0, 0, 1, 1], [], []>} : vector<4x128xf32>, vector<128x128xf32>, vector<4x128xf32> -> vector<4x128xf32>
    %c0_69 = arith.constant 0 : index
    %c0_70 = arith.constant 0 : index
    %168 = vector.load %arg16[%c0_69, %c0_70] : memref<1x128xf32, #tpu.memory_space<vmem>>, vector<1x128xf32>
    %169 = vector.broadcast %168 : vector<1x128xf32> to vector<4x128xf32>
    %170 = arith.addf %167, %169 : vector<4x128xf32>
    %c0_71 = arith.constant 0 : index
    %c0_72 = arith.constant 0 : index
    %171 = vector.load %arg17[%c0_71, %c0_72] : memref<4x128xf32, #tpu.memory_space<vmem>>, vector<4x128xf32>
    tpu.vector_store %arg17[%c0_71, %c0_72], %170 {strides = array<i32>} : memref<4x128xf32, #tpu.memory_space<vmem>>, vector<4x128xf32>,
    return
  }
}

</mosaic_0001>

<bundles_post_ra>
// kernel: tpu_custom_call.1
= control target key start
LH: loop header
LB: loop body
LE: loop exit
PB: predicated region body
PF: predicated region fallthrough
CT: control target
= control target key end

     0   :  { %s2791_s0 = inlined_call_operand.vmem [shape: f32[18,8], index: 0, kind: input, shape index: {}]   ;;  %s2792_s1 = inlined_call_operand.vmem [shape: f32[36,4], index: 1, kind: input, shape index: {}]   ;;  %s2793_s2 = inlined_call_operand.vmem [shape: s32[36,1], index: 2, kind: input, shape index: {}]   ;;  %s2794_s3 = inlined_call_operand.vmem [shape: s32[1,36], index: 3, kind: input, shape index: {}]   ;;  %s2795_s4 = inlined_call_operand.hbm [shape: s32[1,18], index: 4, kind: input, shape index: {}]   ;;  %s2796_s5 = inlined_call_operand.hbm [shape: f32[8,128], index: 5, kind: input, shape index: {}]   ;;  %s2797_s6 = inlined_call_operand.hbm [shape: f32[4,128], index: 6, kind: input, shape index: {}]   ;;  %s2798_s7 = inlined_call_operand.hbm [shape: f32[128,128], index: 7, kind: input, shape index: {}]   ;;  %s2799_s8 = inlined_call_operand.hbm [shape: f32[8,128], index: 8, kind: input, shape index: {}]   ;;  %s2800_s9 = inlined_call_operand.hbm [shape: f32[128,128], index: 9, kind: input, shape index: {}]   ;;  %s2801_s10 = inlined_call_operand.hbm [shape: f32[1,128], index: 10, kind: input, shape index: {}]   ;;  %s2802_s11 = inlined_call_operand.hbm [shape: f32[1,128], index: 11, kind: input, shape index: {}]   ;;  %s2803_s12 = inlined_call_operand.hbm [shape: f32[1,128], index: 12, kind: input, shape index: {}]   ;;  %s2804_s13 = inlined_call_operand.vmem [shape: f32[128,128], index: 13, kind: input, shape index: {}]   ;;  %s2805_s14 = inlined_call_operand.vmem [shape: f32[1,128], index: 14, kind: input, shape index: {}]   ;;  %s2806_s15 = inlined_call_operand.hbm [shape: f32[128,128], index: 15, kind: input, shape index: {}]   ;;  %s2807_s16 = inlined_call_operand.vmem [shape: f32[1,128], index: 16, kind: input, shape index: {}]   ;;  %s2808_s17 = inlined_call_operand.hbm [shape: f32[4,128], index: 17, kind: output, shape index: {}]  }
   0x1   :  { %2811 = sst [smem:[#allocation27_spill]] %s2791_s0 }
   0x2   :  { %2812 = sst [smem:[#allocation28_spill]] %s2792_s1 }
   0x3   :  { %22 = vsyncpa [#allocation3], 0 }
   0x4   :  { %23 = vsyncpa [#allocation6], 0 }
   0x5   :  { %24 = vsyncpa [#allocation9], 0 }
   0x6   :  { %25 = vsyncpa [#allocation12], 0 }
   0x7   :  { %26 = vsyncpa [#allocation15], 0 }
   0x8   :  { %27 = vsyncpa [#allocation18], 0  ;;  %s53_s26 = sshll.u32 %s2796_s5, 4  ;;  %s54_s26 = int_to_ptr.hbm [resolvable:$true] %s53_s26 }
   0x9   :  { %28 = vsyncpa [#allocation4], 0  ;;  %s1958_s27 = smov [#allocation5]   ;;  %s74_s30 = sshll.u32 %s2798_s7, 4  ;;  %s75_s30 = int_to_ptr.hbm [resolvable:$true] %s74_s30 }
   0xa   :  { %s55_s28 = sshll.u32 %s1958_s27, 4  ;;  %s1959_s18 = smov [#allocation8]   ;;  %s56_s28 = int_to_ptr.vmem [resolvable:$true] %s55_s28 }
   0xb   :  { %58 = dma.hbm_to_vmem [thread:$0]  %s54_s26, 128, %s56_s28, [#allocation6]  }
   0xc   :  { %s76_s19 = sshll.u32 %s1959_s18, 4  ;;  %s1960_s1 = smov 128   ;;  %s77_s19 = int_to_ptr.vmem [resolvable:$true] %s76_s19 }
   0xd   :  { %s1961_s20 = smov 8   ;;  %s98_s22 = sshll.u32 %s2800_s9, 4  ;;  %s99_s22 = int_to_ptr.hbm [resolvable:$true] %s98_s22 }
   0xe   :  { %82 = dma.hbm_to_vmem [thread:$0]  %s75_s30, 2048, %s77_s19, [#allocation9], %s1960_s1, %s1960_s1, %s1961_s20  }
   0xf   :  { %s1962_s23 = smov [#allocation11]   ;;  %s123_s26 = sshll.u32 %s2802_s11, 4  ;;  %s124_s26 = int_to_ptr.hbm [resolvable:$true] %s123_s26 }
  0x10   :  { %s100_s24 = sshll.u32 %s1962_s23, 4  ;;  %s1963_s27 = smov [#allocation14]   ;;  %s101_s24 = int_to_ptr.vmem [resolvable:$true] %s100_s24 }
  0x11   :  { %106 = dma.hbm_to_vmem [thread:$0]  %s99_s22, 2048, %s101_s24, [#allocation12], %s1960_s1, %s1960_s1, %s1961_s20  }
  0x12   :  { %s125_s28 = sshll.u32 %s1963_s27, 4  ;;  %s42_s30 = sshll.u32 %s2795_s4, 4  ;;  %s126_s28 = int_to_ptr.vmem [resolvable:$true] %s125_s28  ;;  %s43_s30 = int_to_ptr.hbm [resolvable:$true] %s42_s30 }
  0x13   :  { %128 = dma.hbm_to_vmem [thread:$0]  %s124_s26, 16, %s126_s28, [#allocation15]  }
  0x14   :  { %s64_s19 = sshll.u32 %s2797_s6, 4  ;;  %s1964_s5 = smov [#allocation2]   ;;  %s65_s19 = int_to_ptr.hbm [resolvable:$true] %s64_s19 }
  0x15   :  { %s44_s11 = sshll.u32 %s1964_s5, 4  ;;  %s1965_s21 = smov [#allocation7]   ;;  %s45_s11 = int_to_ptr.vmem [resolvable:$true] %s44_s11 }
  0x16   :  { %47 = dma.hbm_to_vmem [thread:$0]  %s43_s30, 16, %s45_s11, [#allocation3]  }
  0x17   :  { %s66_s22 = sshll.u32 %s1965_s21, 4  ;;  %s88_s7 = sshll.u32 %s2799_s8, 4  ;;  %s67_s22 = int_to_ptr.vmem [resolvable:$true] %s66_s22  ;;  %s89_s7 = int_to_ptr.hbm [resolvable:$true] %s88_s7 }
  0x18   :  { %69 = dma.hbm_to_vmem [thread:$0]  %s65_s19, 64, %s67_s22, [#allocation6]  }
  0x19   :  { %s112_s26 = sshll.u32 %s2801_s10, 4  ;;  %s1966_s27 = smov [#allocation10]   ;;  %s113_s26 = int_to_ptr.hbm [resolvable:$true] %s112_s26 }
  0x1a   :  { %s90_s6 = sshll.u32 %s1966_s27, 4  ;;  %s1967_s28 = smov [#allocation13]   ;;  %s91_s6 = int_to_ptr.vmem [resolvable:$true] %s90_s6 }
  0x1b   :  { %93 = dma.hbm_to_vmem [thread:$0]  %s89_s7, 128, %s91_s6, [#allocation9]  }
  0x1c   :  { %s114_s29 = sshll.u32 %s1967_s28, 4  ;;  %s134_s9 = sshll.u32 %s2803_s12, 4  ;;  %s115_s29 = int_to_ptr.vmem [resolvable:$true] %s114_s29  ;;  %s135_s9 = int_to_ptr.hbm [resolvable:$true] %s134_s9 }
  0x1d   :  { %117 = dma.hbm_to_vmem [thread:$0]  %s113_s26, 16, %s115_s29, [#allocation12]  }
  0x1e   :  { %s148_s19 = sshll.u32 %s2806_s15, 4  ;;  %s1968_s5 = smov [#allocation16]   ;;  %s149_s19 = int_to_ptr.hbm [resolvable:$true] %s148_s19 }
  0x1f   :  { %s136_s10 = sshll.u32 %s1968_s5, 4  ;;  %s1969_s11 = smov [#allocation17]   ;;  %s137_s10 = int_to_ptr.vmem [resolvable:$true] %s136_s10 }
  0x20   :  { %139 = dma.hbm_to_vmem [thread:$0]  %s135_s9, 16, %s137_s10, [#allocation15]  }
  0x21   :  { %s150_s21 = sshll.u32 %s1969_s11, 4  ;;  %s151_s21 = int_to_ptr.vmem [resolvable:$true] %s150_s21 }
  0x22   :  { %156 = dma.hbm_to_vmem [thread:$0]  %s149_s19, 2048, %s151_s21, [#allocation18], %s1960_s1, %s1960_s1, %s1961_s20  }
  0x23   :  { %1944 = dma.done.wait [#allocation3], 16  }
  0x24   :  { %1945 = vsyncadd [#allocation3], 4294967280 }
  0x25   :  { %1946 = dma.done.wait [#allocation6], 192  }
  0x26   :  { %1947 = vsyncadd [#allocation6], 4294967104 }
  0x27   :  { %1948 = dma.done.wait [#allocation9], 2176  }
  0x28   :  { %1949 = vsyncadd [#allocation9], 4294965120 }
  0x29   :  { %1950 = dma.done.wait [#allocation12], 2064  }
  0x2a   :  { %1951 = vsyncadd [#allocation12], 4294965232 }
  0x2b   :  { %1952 = dma.done.wait [#allocation15], 32  }
  0x2c   :  { %1953 = vsyncadd [#allocation15], 4294967264 }
  0x2d   :  { %1954 = dma.done.wait [#allocation18], 2048  }
  0x2e   :  { %1955 = vsyncadd [#allocation18], 4294965248  ;;  %v1970_v0 = vmov 0   ;;  %vm265_vm0 = vcmask 64512   ;;  %v264_v1 = vld [vmem:[#allocation5] sm:$0xff]  ;;  %s2813_s1 = sld [smem:[#allocation27_spill]]  ;;  %v214_v16 = vlaneseq }
  0x2f   :  { %1663 = vset.pattern.permute.xlu0 %v1970_v0  ;;  %1664 = vset.pattern.permute.xlu1 %v1970_v0  ;;  %v207_v3 = vld [vmem:[%s2793_s2] sm:$0xff]  ;;  %v209_v4 = vld [vmem:[%s2793_s2 + $0x10] sm:$0xff]  ;;  %v208_v7 = vld [vmem:[%s2793_s2 + $0x8] sm:$0xff]  ;;  %vm318_vm1 = vcmask 1043456   ;;  %s2814_s18 = sld [smem:[#allocation28_spill]]  ;;  %vm302_vm2 = vcmask 31744  }
  0x30   :  { %1665 = vset.pattern.permute.xlu2 %v1970_v0  ;;  %290 = vmatpush.msra.mxu0 %v264_v1  ;;  %v211_v5 = vld [vmem:[%s2793_s2 + $0x20] sm:$0xf]  ;;  %v210_v8 = vld [vmem:[%s2793_s2 + $0x18] sm:$0xff]  ;;  %v301_v10 = vld [vmem:[#allocation7] sm:$0xf]  ;;  %v215_v17 = vand.u32 127, %v214_v16 }
  0x31   :  { %217 = vperm.xlu0 %1663, %v207_v3   ;;  %223 = vperm.xlu1 %1664, %v209_v4   ;;  %vm370_vm3 = vcmask 1041408   ;;  %v1971_v21 = vmov 0.0   ;;  %vm354_vm5 = vcmask 146432   ;;  %v2179_v36 = vshrl.u32 %v214_v16, 7  ;;  %v1666_v16 = vld [vmem:[%s2794_s3] ss:$0 sm:$0xff] }
  0x32   :  { %229 = vperm.xlu2 %1665, %v211_v5   ;;  %1573 = vmatpush.msk.msra.mxu1 %vm318_vm1, %v301_v10  ;;  %vm517_vm10 = vcmask 1046528   ;;  %vm538_vm11 = vcmask 1040384   ;;  %s1973_s9 = smov [#allocation19]   ;;  %s1546_s19 = sshll.u32 %s2808_s17, 4  ;;  %s1547_s19 = int_to_ptr.hbm [resolvable:$true] %s1546_s19 }
  0x33   :  { %v2188_v42 = vadd.s32 8, %v2179_v36  ;;  %v249_v54 = vadd.s32 16, %v2179_v36  ;;  %v427_v1 = vadd.s32 24, %v2179_v36  ;;  %v428_v5 = vadd.s32 32, %v2179_v36  ;;  %s1544_s8 = sshll.u32 %s1973_s9, 4  ;;  %s1545_s8 = int_to_ptr.vmem [resolvable:$true] %s1544_s8 }
  0x34   :  { %v199_v2 = vld [vmem:[%s2813_s1] sm:$0xff]  ;;  %v200_v6 = vld [vmem:[%s2813_s1 + $0x8] sm:$0xff]  ;;  %v201_v9 = vld [vmem:[%s2813_s1 + $0x10] sm:$0x3]  ;;  %v429_v10 = vand.u32 1, %v2179_v36 }
  0x35   :  { %1570 = vmatmul.msk.f32.vlgmr.msra.gmra.mxu0 %vm265_vm0, %v199_v2  ;;  %v202_v11 = vld [vmem:[%s2814_s18] sm:$0xff]  ;;  %v203_v12 = vld [vmem:[%s2814_s18 + $0x8] sm:$0xff]  ;;  %v204_v14 = vld [vmem:[%s2814_s18 + $0x10] sm:$0xff]  ;;  %v430_v51 = vand.u32 1, %v2188_v42  ;;  %v431_v63 = vand.u32 1, %v249_v54 }
  0x36   :  { %1574 = vmatmul.msk.f32.vlgmr.msra.gmra.mxu1 %vm302_vm2, %v202_v11  ;;  %v205_v19 = vld [vmem:[%s2814_s18 + $0x18] sm:$0xff]  ;;  %v206_v23 = vld [vmem:[%s2814_s18 + $0x20] sm:$0xf]  ;;  %vm2243_vm14 = vcmp.eq.s32.totalorder %v429_v10, 0  ;;  %v1678_v55 = vld [vmem:[%s2813_s1 + $0x8] sm:$0xff] }
  0x37   :  { %vm2203_vm12 = vcmp.eq.s32.totalorder %v430_v51, 0  ;;  %vm2221_vm13 = vcmp.eq.s32.totalorder %v431_v63, 0  ;;  %v2308_v51 = vld [vmem:[#allocation8 + $0x68] sm:$0xff]  ;;  %v2340_v63 = vld [vmem:[#allocation8 + $0x30] sm:$0xff] }
  0x39   :  { %220 = vperm.xlu0 %1663, %v208_v7   ;;  %226 = vperm.xlu1 %1664, %v210_v8  }
  0x3d   :  { %1571 = vmatmul.msk.f32.gmra.mxu0 %vm265_vm0, %v200_v6 }
  0x3e   :  { %1575 = vmatmul.msk.f32.gmra.mxu1 %vm302_vm2, %v203_v12  ;;  %v432_v12 = vand.u32 1, %v427_v1  ;;  %v2348_v1 = vld [vmem:[#allocation8 + $0x20] sm:$0xff] }
  0x40   :  { %vm2247_vm15 = vcmp.eq.s32.totalorder %v432_v12, 0 }
  0x45   :  { %1572 = vmatmul.msk.f32.gmra.mxu0 %vm265_vm0, %v201_v9 }
  0x46   :  { %1576 = vmatmul.msk.f32.gmra.mxu1 %vm302_vm2, %v204_v14  ;;  %v433_v14 = vand.u32 1, %v428_v5  ;;  %v2366_v5 = vld [vmem:[#allocation8 + $0x8] sm:$0xff] }
  0x4e   :  { %1577 = vmatmul.msk.f32.gmra.mxu1 %vm302_vm2, %v205_v19 }
  0x56   :  { %1578 = vmatmul.msk.f32.gmra.mxu1 %vm302_vm2, %v206_v23  ;;  %vm534_vm2 = vcmask 1042432  }
  0x8c   :  { %v230_v30 = vpop.permute.xlu2 %229 }
  0x8d   :  { %vm235_vm9 = vcmp.eq.s32.totalorder %v230_v30, %v215_v17 }
  0x8e   :  { %v2173_v31 = vsel %vm235_vm9, 1.0, %v1971_v21  ;;  %vm253_vm9 = vcmp.eq.s32.totalorder %v1666_v16, %v249_v54  ;;  %v2322_v54 = vld [vmem:[#allocation8 + $0x50] sm:$0xff] }
  0xa3   :  { %v218_v18 = vpop.permute.xlu0 %217  ;;  %v224_v26 = vpop.permute.xlu1 %223 }
  0xa4   :  { %vm231_vm4 = vcmp.eq.s32.totalorder %v218_v18, %v215_v17  ;;  %vm233_vm7 = vcmp.eq.s32.totalorder %v224_v26, %v215_v17 }
  0xa5   :  { %v2149_v22 = vsel %vm231_vm4, 1.0, %v1971_v21  ;;  %v2163_v27 = vsel %vm233_vm7, 1.0, %v1971_v21  ;;  %vm2253_vm4 = vcmp.eq.s32.totalorder %v433_v14, 0  ;;  %vm439_vm7 = vcmask 293888  }
  0xab   :  { %v221_v24 = vpop.permute.xlu0 %220  ;;  %v227_v28 = vpop.permute.xlu1 %226 }
  0xac   :  { %vm232_vm6 = vcmp.eq.s32.totalorder %v221_v24, %v215_v17  ;;  %vm234_vm8 = vcmp.eq.s32.totalorder %v227_v28, %v215_v17  ;;  %v1677_v24 = vld [vmem:[%s2813_s1] sm:$0xff]  ;;  %v1309_v17 = vld [vmem:[#allocation11 + $0x18] sm:$0xff] }
  0xad   :  { %v2158_v25 = vsel %vm232_vm6, 1.0, %v1971_v21  ;;  %v2168_v29 = vsel %vm234_vm8, 1.0, %v1971_v21  ;;  %vm251_vm6 = vcmp.eq.s32.totalorder %v1666_v16, %v2179_v36  ;;  %vm252_vm8 = vcmp.eq.s32.totalorder %v1666_v16, %v2188_v42  ;;  %v2302_v42 = vld [vmem:[#allocation8 + $0x78] sm:$0xff] }
  0xae   :  { %574 = vmatpush.msrb.mxu1 %v2302_v42 }
  0xb2   :  { %v292_v13 = vpop.f32.mrf.mxu0 }
  0xb3   :  { %v339_v32 = vpop.f32.mrf.mxu1 }
  0xba   :  { %v295_v15 = vpop.f32.mrf.mxu0 }
  0xbb   :  { %v342_v34 = vpop.f32.mrf.mxu1 }
  0xc2   :  { %v298_v20 = vpop.f32.mrf.mxu0 }
  0xc3   :  { %1579 = vmatpush.msk.msra.mxu2 %vm370_vm3, %v298_v20  ;;  %v345_v40 = vpop.f32.mrf.mxu1 }
  0xc5   :  { %388 = vmatpush.msra.mxu2 %v295_v15 }
  0xc7   :  { %389 = vmatpush.msra.mxu2 %v292_v13 }
  0xc8   :  { %1580 = vmatmul.msk.f32.vlgmr.msra.gmra.mxu2 %vm354_vm5, %v2149_v22 }
  0xcb   :  { %v348_v53 = vpop.f32.mrf.mxu1 }
  0xd0   :  { %1581 = vmatmul.msk.f32.gmra.mxu2 %vm354_vm5, %v2158_v25 }
  0xd3   :  { %v351_v6 = vpop.f32.mrf.mxu1 }
  0xd8   :  { %1582 = vmatmul.msk.f32.gmra.mxu2 %vm354_vm5, %v2163_v27 }
  0xe0   :  { %1583 = vmatmul.msk.f32.gmra.mxu2 %vm354_vm5, %v2168_v29 }
  0xe8   :  { %1584 = vmatmul.msk.f32.gmra.mxu2 %vm354_vm5, %v2173_v31 }
 0x14b   :  { %v391_v33 = vpop.f32.mrf.mxu2 }
 0x14c   :  { %v2177_v35 = vadd.f32 %v391_v33, %v339_v32 }
 0x14e   :  { %v2184_v39 = vmax.f32 %v2177_v35, 0.0 }
 0x150   :  { %v518_v43 = vrot.slane %v2184_v39, 1  ;;  %v539_v45 = vrot.slane %v2184_v39, 7  ;;  %v532_v19 = vrot.slane %v2184_v39, 5 }
 0x153   :  { %v394_v37 = vpop.f32.mrf.mxu2 }
 0x154   :  { %v2181_v38 = vadd.f32 %v394_v37, %v342_v34 }
 0x156   :  { %v407_v41 = vmax.f32 %v2181_v38, 0.0 }
 0x158   :  { %v519_v44 = vrot.slane %v407_v41, 1  ;;  %v540_v46 = vrot.slane %v407_v41, 7 }
 0x15a   :  { %v2193_v47 = vsel %vm517_vm10, %v518_v43, %v519_v44  ;;  %v2196_v48 = vsel %vm538_vm11, %v539_v45, %v540_v46  ;;  %v2283_v43 = vsel %vm251_vm6, 1.0, %v1971_v21 }
 0x15b   :  { %v397_v49 = vpop.f32.mrf.mxu2 }
 0x15c   :  { %v2198_v50 = vadd.f32 %v397_v49, %v345_v40  ;;  %v2304_v49 = vld [vmem:[#allocation8 + $0x70] sm:$0xff] }
 0x15d   :  { %575 = vmatpush.msrb.mxu1 %v2304_v49 }
 0x15e   :  { %v408_v52 = vmax.f32 %v2198_v50, 0.0 }
 0x15f   :  { %576 = vmatpush.msrb.mxu1 %v2308_v51 }
 0x160   :  { %v521_v56 = vrot.slane %v408_v52, 1  ;;  %v542_v57 = vrot.slane %v408_v52, 7 }
 0x162   :  { %v2208_v58 = vsel %vm517_vm10, %v519_v44, %v521_v56  ;;  %v2211_v59 = vsel %vm538_vm11, %v540_v46, %v542_v57  ;;  %v2290_v44 = vsel %vm252_vm8, 1.0, %v1971_v21 }
 0x163   :  { %v400_v60 = vpop.f32.mrf.mxu2  ;;  %v565_v61 = vsel %vm2203_vm12, %v2208_v58, %v2196_v48 }
 0x164   :  { %v2217_v62 = vadd.f32 %v400_v60, %v348_v53  ;;  %v2316_v53 = vld [vmem:[#allocation8 + $0x58] sm:$0xff] }
 0x165   :  { %v2334_v60 = vld [vmem:[#allocation8 + $0x38] sm:$0xff] }
 0x166   :  { %v409_v0 = vmax.f32 %v2217_v62, 0.0 }
 0x168   :  { %v523_v3 = vrot.slane %v409_v0, 1  ;;  %v544_v4 = vrot.slane %v409_v0, 7 }
 0x16a   :  { %v2227_v7 = vsel %vm517_vm10, %v521_v56, %v523_v3  ;;  %v2230_v8 = vsel %vm538_vm11, %v542_v57, %v544_v4  ;;  %v2326_v56 = vld [vmem:[#allocation8 + $0x48] sm:$0xff]  ;;  %v2330_v57 = vld [vmem:[#allocation8 + $0x40] sm:$0xff] }
 0x16b   :  { %v403_v9 = vpop.f32.mrf.mxu2  ;;  %v566_v11 = vsel %vm2221_vm13, %v2227_v7, %v2211_v59 }
 0x16c   :  { %v2237_v13 = vadd.f32 %v403_v9, %v351_v6  ;;  %v2370_v6 = vld [vmem:[#allocation8] sm:$0xff] }
 0x16e   :  { %v410_v15 = vmax.f32 %v2237_v13, 0.0 }
 0x170   :  { %1585 = vmatpush.msk.msra.mxu3 %vm318_vm1, %v410_v15  ;;  %v536_v20 = vrot.slane %v410_v15, 3  ;;  %v525_v23 = vrot.slane %v410_v15, 1  ;;  %v546_v26 = vrot.slane %v410_v15, 7 }
 0x172   :  { %464 = vmatpush.msra.mxu3 %v409_v0  ;;  %v2258_v28 = vsel %vm538_vm11, %v536_v20, %v539_v45  ;;  %v2261_v30 = vsel %vm517_vm10, %v523_v3, %v525_v23  ;;  %v2264_v32 = vsel %vm534_vm2, %v525_v23, %v532_v19  ;;  %v2267_v33 = vsel %vm538_vm11, %v544_v4, %v546_v26  ;;  %v2344_v0 = vld [vmem:[#allocation8 + $0x28] sm:$0xff]  ;;  %v2352_v3 = vld [vmem:[#allocation8 + $0x18] sm:$0xff]  ;;  %v2358_v4 = vld [vmem:[#allocation8 + $0x10] sm:$0xff] }
 0x173   :  { %v564_v34 = vsel %vm2243_vm14, %v2193_v47, %v2258_v28  ;;  %v567_v37 = vsel %vm2247_vm15, %v2261_v30, %v2230_v8  ;;  %v568_v40 = vsel %vm2253_vm4, %v2264_v32, %v2267_v33 }
 0x174   :  { %465 = vmatpush.msra.mxu3 %v408_v52  ;;  %v2312_v52 = vld [vmem:[#allocation8 + $0x60] sm:$0xff] }
 0x175   :  { %577 = vmatpush.msrb.mxu1 %v2312_v52 }
 0x176   :  { %466 = vmatpush.msra.mxu3 %v407_v41  ;;  %v2295_v41 = vsel %vm253_vm9, 1.0, %v1971_v21 }
 0x177   :  { %578 = vmatpush.msrb.mxu1 %v2316_v53 }
 0x178   :  { %467 = vmatpush.msra.mxu3 %v2184_v39 }
 0x179   :  { %1586 = vmatmul.msk.f32.vlgmr.msra.gmra.mxu3 %vm439_vm7, %v2283_v43  ;;  %579 = vmatpush.msrb.mxu1 %v2322_v54 }
 0x17b   :  { %580 = vmatpush.msrb.mxu1 %v2326_v56 }
 0x17d   :  { %581 = vmatpush.msrb.mxu1 %v2330_v57 }
 0x17f   :  { %582 = vmatpush.msrb.mxu1 %v2334_v60 }
 0x181   :  { %1587 = vmatmul.msk.f32.gmra.mxu3 %vm439_vm7, %v2290_v44  ;;  %583 = vmatpush.msrb.mxu1 %v2340_v63 }
 0x183   :  { %584 = vmatpush.msrb.mxu1 %v2344_v0 }
 0x185   :  { %585 = vmatpush.msrb.mxu1 %v2348_v1 }
 0x187   :  { %586 = vmatpush.msrb.mxu1 %v2352_v3 }
 0x189   :  { %1588 = vmatmul.msk.f32.gmra.mxu3 %vm439_vm7, %v2295_v41  ;;  %587 = vmatpush.msrb.mxu1 %v2358_v4 }
 0x18b   :  { %588 = vmatpush.msrb.mxu1 %v2366_v5 }
 0x18d   :  { %589 = vmatpush.msrb.mxu1 %v2370_v6 }
 0x1fc   :  { %v469_v45 = vpop.f32.mrf.mxu3 }
 0x204   :  { %v472_v39 = vpop.f32.mrf.mxu3 }
 0x20c   :  { %v475_v46 = vpop.f32.mrf.mxu3 }
 0x20d   :  { %1589 = vmatpush.msk.msrb.mxu0 %vm370_vm3, %v475_v46 }
 0x20f   :  { %495 = vmatpush.msrb.mxu0 %v472_v39 }
 0x211   :  { %496 = vmatpush.msrb.mxu0 %v469_v45 }
 0x212   :  { %1590 = vmatmul.msk.f32.vlgmr.msrb.gmra.mxu0 %vm354_vm5, %v2149_v22 }
 0x213   :  { %728 = vmatpush.msra.mxu0 %v2302_v42 }
 0x215   :  { %729 = vmatpush.msra.mxu0 %v2304_v49 }
 0x217   :  { %730 = vmatpush.msra.mxu0 %v2308_v51 }
 0x219   :  { %731 = vmatpush.msra.mxu0 %v2312_v52 }
 0x21a   :  { %1591 = vmatmul.msk.f32.gmra.mxu0 %vm354_vm5, %v2158_v25 }
 0x21b   :  { %732 = vmatpush.msra.mxu0 %v2316_v53 }
 0x21d   :  { %733 = vmatpush.msra.mxu0 %v2322_v54 }
 0x21f   :  { %734 = vmatpush.msra.mxu0 %v2326_v56 }
 0x221   :  { %735 = vmatpush.msra.mxu0 %v2330_v57 }
 0x222   :  { %1592 = vmatmul.msk.f32.gmra.mxu0 %vm354_vm5, %v2163_v27 }
 0x223   :  { %736 = vmatpush.msra.mxu0 %v2334_v60 }
 0x225   :  { %737 = vmatpush.msra.mxu0 %v2340_v63 }
 0x227   :  { %738 = vmatpush.msra.mxu0 %v2344_v0 }
 0x229   :  { %739 = vmatpush.msra.mxu0 %v2348_v1 }
 0x22a   :  { %1593 = vmatmul.msk.f32.gmra.mxu0 %vm354_vm5, %v2168_v29 }
 0x22b   :  { %740 = vmatpush.msra.mxu0 %v2352_v3 }
 0x22d   :  { %741 = vmatpush.msra.mxu0 %v2358_v4 }
 0x22f   :  { %742 = vmatpush.msra.mxu0 %v2366_v5 }
 0x231   :  { %743 = vmatpush.msra.mxu0 %v2370_v6 }
 0x232   :  { %1594 = vmatmul.msk.f32.gmra.mxu0 %vm354_vm5, %v2173_v31 }
 0x28f   :  { %v498_v9 = vpop.f32.mrf.mxu0 }
 0x290   :  { %v569_v10 = vsub.f32 %v498_v9, %v564_v34 }
 0x292   :  { %590 = vmatmul.f32.vlgmr.msrb.gmra.mxu1 %v569_v10 }
 0x297   :  { %v501_v12 = vpop.f32.mrf.mxu0 }
 0x298   :  { %v570_v14 = vsub.f32 %v501_v12, %v565_v61 }
 0x29a   :  { %593 = vmatmul.f32.gmra.mxu1 %v570_v14 }
 0x29f   :  { %v504_v15 = vpop.f32.mrf.mxu0 }
 0x2a0   :  { %v571_v16 = vsub.f32 %v504_v15, %v566_v11 }
 0x2a2   :  { %596 = vmatmul.f32.gmra.mxu1 %v571_v16 }
 0x2a7   :  { %v507_v19 = vpop.f32.mrf.mxu0 }
 0x2a8   :  { %v572_v47 = vsub.f32 %v507_v19, %v567_v37 }
 0x2aa   :  { %599 = vmatmul.f32.gmra.mxu1 %v572_v47 }
 0x2af   :  { %v510_v20 = vpop.f32.mrf.mxu0 }
 0x2b0   :  { %v573_v48 = vsub.f32 %v510_v20, %v568_v40 }
 0x2b2   :  { %602 = vmatmul.f32.gmra.mxu1 %v573_v48 }
 0x30f   :  { %v591_v58 = vpop.f32.mrf.mxu1 }
 0x310   :  { %v606_v59 = vadd.f32 %v591_v58, %v2177_v35 }
 0x312   :  { %v611_v7 = vmax.f32 %v606_v59, 0.0 }
 0x314   :  { %v684_v28 = vrot.slane %v611_v7, 1  ;;  %v703_v30 = vrot.slane %v611_v7, 7 }
 0x317   :  { %v594_v61 = vpop.f32.mrf.mxu1 }
 0x318   :  { %v607_v11 = vadd.f32 %v594_v61, %v2181_v38 }
 0x31a   :  { %v612_v23 = vmax.f32 %v607_v11, 0.0 }
 0x31c   :  { %v685_v26 = vrot.slane %v612_v23, 1  ;;  %v704_v8 = vrot.slane %v612_v23, 7 }
 0x31e   :  { %v2402_v34 = vsel %vm517_vm10, %v684_v28, %v685_v26  ;;  %v2405_v37 = vsel %vm538_vm11, %v703_v30, %v704_v8 }
 0x31f   :  { %v597_v32 = vpop.f32.mrf.mxu1 }
 0x320   :  { %v608_v33 = vadd.f32 %v597_v32, %v2198_v50 }
 0x322   :  { %v613_v40 = vmax.f32 %v608_v33, 0.0 }
 0x324   :  { %v687_v45 = vrot.slane %v613_v40, 1  ;;  %v706_v39 = vrot.slane %v613_v40, 7 }
 0x326   :  { %v2409_v46 = vsel %vm517_vm10, %v685_v26, %v687_v45  ;;  %v2412_v9 = vsel %vm538_vm11, %v704_v8, %v706_v39  ;;  %v698_v8 = vrot.slane %v611_v7, 5 }
 0x327   :  { %v600_v10 = vpop.f32.mrf.mxu1  ;;  %v719_v12 = vsel %vm2203_vm12, %v2409_v46, %v2405_v37 }
 0x328   :  { %v609_v14 = vadd.f32 %v600_v10, %v2217_v62 }
 0x32a   :  { %v614_v15 = vmax.f32 %v609_v14, 0.0 }
 0x32c   :  { %v689_v16 = vrot.slane %v614_v15, 1  ;;  %v708_v19 = vrot.slane %v614_v15, 7 }
 0x32e   :  { %v690_v47 = vsel %vm517_vm10, %v687_v45, %v689_v16  ;;  %v709_v20 = vsel %vm538_vm11, %v706_v39, %v708_v19 }
 0x32f   :  { %v603_v48 = vpop.f32.mrf.mxu1  ;;  %v720_v58 = vsel %vm2221_vm13, %v690_v47, %v2412_v9 }
 0x330   :  { %v610_v59 = vadd.f32 %v603_v48, %v2237_v13 }
 0x332   :  { %v615_v61 = vmax.f32 %v610_v59, 0.0 }
 0x334   :  { %1595 = vmatpush.msk.msrb.mxu3 %vm318_vm1, %v615_v61  ;;  %v701_v11 = vrot.slane %v615_v61, 3  ;;  %v691_v26 = vrot.slane %v615_v61, 1  ;;  %v710_v28 = vrot.slane %v615_v61, 7 }
 0x336   :  { %631 = vmatpush.msrb.mxu3 %v614_v15  ;;  %v717_v37 = vsel %vm538_vm11, %v701_v11, %v703_v30  ;;  %v692_v32 = vsel %vm517_vm10, %v689_v16, %v691_v26  ;;  %v700_v33 = vsel %vm534_vm2, %v691_v26, %v698_v8  ;;  %v711_v45 = vsel %vm538_vm11, %v708_v19, %v710_v28 }
 0x337   :  { %v718_v39 = vsel %vm2243_vm14, %v2402_v34, %v717_v37  ;;  %v721_v46 = vsel %vm2247_vm15, %v692_v32, %v709_v20  ;;  %v722_v9 = vsel %vm2253_vm4, %v700_v33, %v711_v45 }
 0x338   :  { %632 = vmatpush.msrb.mxu3 %v613_v40 }
 0x33a   :  { %633 = vmatpush.msrb.mxu3 %v612_v23 }
 0x33c   :  { %634 = vmatpush.msrb.mxu3 %v611_v7 }
 0x33d   :  { %1596 = vmatmul.msk.f32.vlgmr.msrb.gmra.mxu3 %vm439_vm7, %v2283_v43 }
 0x345   :  { %1597 = vmatmul.msk.f32.gmra.mxu3 %vm439_vm7, %v2290_v44 }
 0x34d   :  { %1598 = vmatmul.msk.f32.gmra.mxu3 %vm439_vm7, %v2295_v41 }
 0x3c0   :  { %v636_v30 = vpop.f32.mrf.mxu3 }
 0x3c8   :  { %v639_v34 = vpop.f32.mrf.mxu3 }
 0x3d0   :  { %v642_v10 = vpop.f32.mrf.mxu3 }
 0x3d1   :  { %1599 = vmatpush.msk.msrb.mxu2 %vm370_vm3, %v642_v10 }
 0x3d3   :  { %662 = vmatpush.msrb.mxu2 %v639_v34 }
 0x3d5   :  { %663 = vmatpush.msrb.mxu2 %v636_v30 }
 0x3d6   :  { %1600 = vmatmul.msk.f32.vlgmr.msrb.gmra.mxu2 %vm354_vm5, %v2149_v22 }
 0x3d7   :  { %882 = vmatpush.msra.mxu2 %v2302_v42 }
 0x3d9   :  { %883 = vmatpush.msra.mxu2 %v2304_v49 }
 0x3db   :  { %884 = vmatpush.msra.mxu2 %v2308_v51 }
 0x3dd   :  { %885 = vmatpush.msra.mxu2 %v2312_v52 }
 0x3de   :  { %1601 = vmatmul.msk.f32.gmra.mxu2 %vm354_vm5, %v2158_v25 }
 0x3df   :  { %886 = vmatpush.msra.mxu2 %v2316_v53 }
 0x3e1   :  { %887 = vmatpush.msra.mxu2 %v2322_v54 }
 0x3e3   :  { %888 = vmatpush.msra.mxu2 %v2326_v56 }
 0x3e5   :  { %889 = vmatpush.msra.mxu2 %v2330_v57 }
 0x3e6   :  { %1602 = vmatmul.msk.f32.gmra.mxu2 %vm354_vm5, %v2163_v27 }
 0x3e7   :  { %890 = vmatpush.msra.mxu2 %v2334_v60 }
 0x3e9   :  { %891 = vmatpush.msra.mxu2 %v2340_v63 }
 0x3eb   :  { %892 = vmatpush.msra.mxu2 %v2344_v0 }
 0x3ed   :  { %893 = vmatpush.msra.mxu2 %v2348_v1 }
 0x3ee   :  { %1603 = vmatmul.msk.f32.gmra.mxu2 %vm354_vm5, %v2168_v29 }
 0x3ef   :  { %894 = vmatpush.msra.mxu2 %v2352_v3 }
 0x3f1   :  { %895 = vmatpush.msra.mxu2 %v2358_v4 }
 0x3f3   :  { %896 = vmatpush.msra.mxu2 %v2366_v5 }
 0x3f5   :  { %897 = vmatpush.msra.mxu2 %v2370_v6 }
 0x3f6   :  { %1604 = vmatmul.msk.f32.gmra.mxu2 %vm354_vm5, %v2173_v31 }
 0x459   :  { %v665_v7 = vpop.f32.mrf.mxu2 }
 0x45a   :  { %v723_v23 = vsub.f32 %v665_v7, %v718_v39 }
 0x45c   :  { %744 = vmatmul.f32.vlgmr.msra.gmra.mxu0 %v723_v23 }
 0x461   :  { %v668_v40 = vpop.f32.mrf.mxu2 }
 0x462   :  { %v724_v14 = vsub.f32 %v668_v40, %v719_v12 }
 0x464   :  { %747 = vmatmul.f32.gmra.mxu0 %v724_v14 }
 0x469   :  { %v671_v15 = vpop.f32.mrf.mxu2 }
 0x46a   :  { %v725_v16 = vsub.f32 %v671_v15, %v720_v58 }
 0x46c   :  { %750 = vmatmul.f32.gmra.mxu0 %v725_v16 }
 0x471   :  { %v674_v19 = vpop.f32.mrf.mxu2 }
 0x472   :  { %v726_v47 = vsub.f32 %v674_v19, %v721_v46 }
 0x474   :  { %753 = vmatmul.f32.gmra.mxu0 %v726_v47 }
 0x479   :  { %v677_v20 = vpop.f32.mrf.mxu2 }
 0x47a   :  { %v727_v48 = vsub.f32 %v677_v20, %v722_v9 }
 0x47c   :  { %756 = vmatmul.f32.gmra.mxu0 %v727_v48 }
 0x4d9   :  { %v745_v59 = vpop.f32.mrf.mxu0 }
 0x4da   :  { %v760_v61 = vadd.f32 %v745_v59, %v2177_v35 }
 0x4dc   :  { %v765_v26 = vmax.f32 %v760_v61, 0.0 }
 0x4de   :  { %v838_v32 = vrot.slane %v765_v26, 1  ;;  %v857_v33 = vrot.slane %v765_v26, 7 }
 0x4e1   :  { %v748_v11 = vpop.f32.mrf.mxu0 }
 0x4e2   :  { %v761_v8 = vadd.f32 %v748_v11, %v2181_v38 }
 0x4e4   :  { %v766_v28 = vmax.f32 %v761_v8, 0.0 }
 0x4e6   :  { %v839_v37 = vrot.slane %v766_v28, 1  ;;  %v858_v12 = vrot.slane %v766_v28, 7 }
 0x4e8   :  { %v840_v58 = vsel %vm517_vm10, %v838_v32, %v839_v37  ;;  %v859_v45 = vsel %vm538_vm11, %v857_v33, %v858_v12 }
 0x4e9   :  { %v751_v39 = vpop.f32.mrf.mxu0 }
 0x4ea   :  { %v762_v46 = vadd.f32 %v751_v39, %v2198_v50 }
 0x4ec   :  { %v767_v9 = vmax.f32 %v762_v46, 0.0 }
 0x4ee   :  { %v841_v30 = vrot.slane %v767_v9, 1  ;;  %v860_v34 = vrot.slane %v767_v9, 7 }
 0x4f0   :  { %v842_v10 = vsel %vm517_vm10, %v839_v37, %v841_v30  ;;  %v861_v7 = vsel %vm538_vm11, %v858_v12, %v860_v34  ;;  %v852_v12 = vrot.slane %v765_v26, 5 }
 0x4f1   :  { %v754_v23 = vpop.f32.mrf.mxu0  ;;  %v873_v40 = vsel %vm2203_vm12, %v842_v10, %v859_v45 }
 0x4f2   :  { %v763_v14 = vadd.f32 %v754_v23, %v2217_v62 }
 0x4f4   :  { %v768_v15 = vmax.f32 %v763_v14, 0.0 }
 0x4f6   :  { %v843_v16 = vrot.slane %v768_v15, 1  ;;  %v862_v19 = vrot.slane %v768_v15, 7 }
 0x4f8   :  { %v844_v47 = vsel %vm517_vm10, %v841_v30, %v843_v16  ;;  %v863_v20 = vsel %vm538_vm11, %v860_v34, %v862_v19 }
 0x4f9   :  { %v757_v48 = vpop.f32.mrf.mxu0  ;;  %v874_v59 = vsel %vm2221_vm13, %v844_v47, %v861_v7 }
 0x4fa   :  { %v764_v61 = vadd.f32 %v757_v48, %v2237_v13 }
 0x4fc   :  { %v769_v11 = vmax.f32 %v764_v61, 0.0 }
 0x4fe   :  { %1605 = vmatpush.msk.msra.mxu3 %vm318_vm1, %v769_v11  ;;  %v855_v8 = vrot.slane %v769_v11, 3  ;;  %v845_v37 = vrot.slane %v769_v11, 1  ;;  %v864_v32 = vrot.slane %v769_v11, 7 }
 0x500   :  { %785 = vmatpush.msra.mxu3 %v768_v15  ;;  %v871_v45 = vsel %vm538_vm11, %v855_v8, %v857_v33  ;;  %v846_v39 = vsel %vm517_vm10, %v843_v16, %v845_v37  ;;  %v854_v46 = vsel %vm534_vm2, %v845_v37, %v852_v12  ;;  %v865_v30 = vsel %vm538_vm11, %v862_v19, %v864_v32 }
 0x501   :  { %v872_v34 = vsel %vm2243_vm14, %v840_v58, %v871_v45  ;;  %v875_v10 = vsel %vm2247_vm15, %v846_v39, %v863_v20  ;;  %v876_v7 = vsel %vm2253_vm4, %v854_v46, %v865_v30 }
 0x502   :  { %786 = vmatpush.msra.mxu3 %v767_v9 }
 0x504   :  { %787 = vmatpush.msra.mxu3 %v766_v28 }
 0x506   :  { %788 = vmatpush.msra.mxu3 %v765_v26 }
 0x507   :  { %1606 = vmatmul.msk.f32.vlgmr.msra.gmra.mxu3 %vm439_vm7, %v2283_v43 }
 0x50f   :  { %1607 = vmatmul.msk.f32.gmra.mxu3 %vm439_vm7, %v2290_v44 }
 0x517   :  { %1608 = vmatmul.msk.f32.gmra.mxu3 %vm439_vm7, %v2295_v41 }
 0x58a   :  { %v790_v33 = vpop.f32.mrf.mxu3 }
 0x592   :  { %v793_v58 = vpop.f32.mrf.mxu3 }
 0x59a   :  { %v796_v23 = vpop.f32.mrf.mxu3 }
 0x59b   :  { %1609 = vmatpush.msk.msra.mxu1 %vm370_vm3, %v796_v23 }
 0x59d   :  { %816 = vmatpush.msra.mxu1 %v793_v58 }
 0x59f   :  { %817 = vmatpush.msra.mxu1 %v790_v33 }
 0x5a0   :  { %1610 = vmatmul.msk.f32.vlgmr.msra.gmra.mxu1 %vm354_vm5, %v2149_v22 }
 0x5a8   :  { %1611 = vmatmul.msk.f32.gmra.mxu1 %vm354_vm5, %v2158_v25 }
 0x5b0   :  { %1612 = vmatmul.msk.f32.gmra.mxu1 %vm354_vm5, %v2163_v27 }
 0x5b8   :  { %1613 = vmatmul.msk.f32.gmra.mxu1 %vm354_vm5, %v2168_v29 }
 0x5c0   :  { %1614 = vmatmul.msk.f32.gmra.mxu1 %vm354_vm5, %v2173_v31 }
 0x61d   :  { %v819_v26 = vpop.f32.mrf.mxu1 }
 0x61e   :  { %v877_v28 = vsub.f32 %v819_v26, %v872_v34 }
 0x620   :  { %898 = vmatmul.f32.vlgmr.msra.gmra.mxu2 %v877_v28 }
 0x625   :  { %v822_v9 = vpop.f32.mrf.mxu1 }
 0x626   :  { %v878_v14 = vsub.f32 %v822_v9, %v873_v40 }
 0x628   :  { %901 = vmatmul.f32.gmra.mxu2 %v878_v14 }
 0x62d   :  { %v825_v15 = vpop.f32.mrf.mxu1 }
 0x62e   :  { %v879_v16 = vsub.f32 %v825_v15, %v874_v59 }
 0x630   :  { %904 = vmatmul.f32.gmra.mxu2 %v879_v16 }
 0x635   :  { %v828_v19 = vpop.f32.mrf.mxu1 }
 0x636   :  { %v880_v47 = vsub.f32 %v828_v19, %v875_v10 }
 0x638   :  { %907 = vmatmul.f32.gmra.mxu2 %v880_v47 }
 0x63d   :  { %v831_v20 = vpop.f32.mrf.mxu1 }
 0x63e   :  { %v881_v48 = vsub.f32 %v831_v20, %v876_v7 }
 0x640   :  { %910 = vmatmul.f32.gmra.mxu2 %v881_v48 }
 0x6a3   :  { %v899_v61 = vpop.f32.mrf.mxu2 }
 0x6a4   :  { %v914_v11 = vadd.f32 %v899_v61, %v2177_v35 }
 0x6a6   :  { %v919_v37 = vmax.f32 %v914_v11, 0.0 }
 0x6a8   :  { %v992_v39 = vrot.slane %v919_v37, 1  ;;  %v1011_v46 = vrot.slane %v919_v37, 7 }
 0x6ab   :  { %v902_v8 = vpop.f32.mrf.mxu2 }
 0x6ac   :  { %v915_v12 = vadd.f32 %v902_v8, %v2181_v38 }
 0x6ae   :  { %v920_v32 = vmax.f32 %v915_v12, 0.0 }
 0x6b0   :  { %v993_v45 = vrot.slane %v920_v32, 1  ;;  %v1012_v40 = vrot.slane %v920_v32, 7 }
 0x6b2   :  { %v2516_v59 = vsel %vm517_vm10, %v992_v39, %v993_v45  ;;  %v2519_v30 = vsel %vm538_vm11, %v1011_v46, %v1012_v40 }
 0x6b3   :  { %v905_v34 = vpop.f32.mrf.mxu2 }
 0x6b4   :  { %v916_v10 = vadd.f32 %v905_v34, %v2198_v50 }
 0x6b6   :  { %v921_v7 = vmax.f32 %v916_v10, 0.0 }
 0x6b8   :  { %v995_v33 = vrot.slane %v921_v7, 1  ;;  %v1014_v58 = vrot.slane %v921_v7, 7 }
 0x6ba   :  { %v2523_v23 = vsel %vm517_vm10, %v993_v45, %v995_v33  ;;  %v2526_v26 = vsel %vm538_vm11, %v1012_v40, %v1014_v58  ;;  %v1006_v40 = vrot.slane %v919_v37, 5 }
 0x6bb   :  { %v908_v28 = vpop.f32.mrf.mxu2  ;;  %v1027_v9 = vsel %vm2203_vm12, %v2523_v23, %v2519_v30 }
 0x6bc   :  { %v917_v14 = vadd.f32 %v908_v28, %v2217_v62 }
 0x6be   :  { %v922_v15 = vmax.f32 %v917_v14, 0.0 }
 0x6c0   :  { %v997_v16 = vrot.slane %v922_v15, 1  ;;  %v1016_v19 = vrot.slane %v922_v15, 7 }
 0x6c2   :  { %v2534_v47 = vsel %vm517_vm10, %v995_v33, %v997_v16  ;;  %v2537_v20 = vsel %vm538_vm11, %v1014_v58, %v1016_v19 }
 0x6c3   :  { %v911_v48 = vpop.f32.mrf.mxu2  ;;  %v1028_v61 = vsel %vm2221_vm13, %v2534_v47, %v2526_v26 }
 0x6c4   :  { %v918_v11 = vadd.f32 %v911_v48, %v2237_v13 }
 0x6c6   :  { %v923_v8 = vmax.f32 %v918_v11, 0.0 }
 0x6c8   :  { %1615 = vmatpush.msk.msrb.mxu3 %vm318_vm1, %v923_v8  ;;  %v1009_v12 = vrot.slane %v923_v8, 3  ;;  %v999_v45 = vrot.slane %v923_v8, 1  ;;  %v1018_v39 = vrot.slane %v923_v8, 7 }
 0x6ca   :  { %939 = vmatpush.msrb.mxu3 %v922_v15  ;;  %v1025_v34 = vsel %vm538_vm11, %v1009_v12, %v1011_v46  ;;  %v2547_v10 = vsel %vm534_vm2, %v999_v45, %v1006_v40  ;;  %v2550_v33 = vsel %vm538_vm11, %v1016_v19, %v1018_v39  ;;  %v2553_v58 = vsel %vm517_vm10, %v997_v16, %v999_v45 }
 0x6cb   :  { %v1026_v28 = vsel %vm2243_vm14, %v2516_v59, %v1025_v34  ;;  %v1030_v14 = vsel %vm2253_vm4, %v2547_v10, %v2550_v33  ;;  %v1029_v46 = vsel %vm2247_vm15, %v2553_v58, %v2537_v20 }
 0x6cc   :  { %940 = vmatpush.msrb.mxu3 %v921_v7 }
 0x6ce   :  { %941 = vmatpush.msrb.mxu3 %v920_v32 }
 0x6d0   :  { %942 = vmatpush.msrb.mxu3 %v919_v37 }
 0x6d1   :  { %1616 = vmatmul.msk.f32.vlgmr.msrb.gmra.mxu3 %vm439_vm7, %v2283_v43 }
 0x6d2   :  { %1036 = vmatpush.msra.mxu3 %v2302_v42 }
 0x6d4   :  { %1037 = vmatpush.msra.mxu3 %v2304_v49 }
 0x6d6   :  { %1038 = vmatpush.msra.mxu3 %v2308_v51 }
 0x6d8   :  { %1039 = vmatpush.msra.mxu3 %v2312_v52 }
 0x6d9   :  { %1617 = vmatmul.msk.f32.gmra.mxu3 %vm439_vm7, %v2290_v44 }
 0x6da   :  { %1040 = vmatpush.msra.mxu3 %v2316_v53 }
 0x6dc   :  { %1041 = vmatpush.msra.mxu3 %v2322_v54 }
 0x6de   :  { %1042 = vmatpush.msra.mxu3 %v2326_v56 }
 0x6e0   :  { %1043 = vmatpush.msra.mxu3 %v2330_v57 }
 0x6e1   :  { %1618 = vmatmul.msk.f32.gmra.mxu3 %vm439_vm7, %v2295_v41 }
 0x6e2   :  { %1044 = vmatpush.msra.mxu3 %v2334_v60 }
 0x6e4   :  { %1045 = vmatpush.msra.mxu3 %v2340_v63 }
 0x6e6   :  { %1046 = vmatpush.msra.mxu3 %v2344_v0 }
 0x6e8   :  { %1047 = vmatpush.msra.mxu3 %v2348_v1 }
 0x6ea   :  { %1048 = vmatpush.msra.mxu3 %v2352_v3 }
 0x6ec   :  { %1049 = vmatpush.msra.mxu3 %v2358_v4 }
 0x6ee   :  { %1050 = vmatpush.msra.mxu3 %v2366_v5 }
 0x6f0   :  { %1051 = vmatpush.msra.mxu3 %v2370_v6 }
 0x754   :  { %v944_v37 = vpop.f32.mrf.mxu3 }
 0x75c   :  { %v947_v32 = vpop.f32.mrf.mxu3 }
 0x764   :  { %v950_v59 = vpop.f32.mrf.mxu3 }
 0x765   :  { %1619 = vmatpush.msk.msrb.mxu0 %vm370_vm3, %v950_v59  ;;  %1644 = vmatpush.msk.msrb.mxu1 %vm370_vm3, %v950_v59 }
 0x767   :  { %970 = vmatpush.msrb.mxu0 %v947_v32  ;;  %1645 = vmatpush.msrb.mxu1 %v947_v32 }
 0x769   :  { %971 = vmatpush.msrb.mxu0 %v944_v37  ;;  %1646 = vmatpush.msrb.mxu1 %v944_v37 }
 0x76a   :  { %1620 = vmatmul.msk.f32.vlgmr.msrb.gmra.mxu0 %vm354_vm5, %v2149_v22  ;;  %1624 = vmatmul.msk.f32.vlgmr.msrb.gmra.mxu1 %vm354_vm5, %v2173_v31 }
 0x76b   :  { %1190 = vmatpush.msra.mxu0 %v2302_v42 }
 0x76d   :  { %1191 = vmatpush.msra.mxu0 %v2304_v49 }
 0x76f   :  { %1192 = vmatpush.msra.mxu0 %v2308_v51 }
 0x771   :  { %1193 = vmatpush.msra.mxu0 %v2312_v52 }
 0x772   :  { %1621 = vmatmul.msk.f32.gmra.mxu0 %vm354_vm5, %v2158_v25 }
 0x773   :  { %1194 = vmatpush.msra.mxu0 %v2316_v53 }
 0x775   :  { %1195 = vmatpush.msra.mxu0 %v2322_v54 }
 0x777   :  { %1196 = vmatpush.msra.mxu0 %v2326_v56 }
 0x779   :  { %1197 = vmatpush.msra.mxu0 %v2330_v57 }
 0x77a   :  { %1622 = vmatmul.msk.f32.gmra.mxu0 %vm354_vm5, %v2163_v27 }
 0x77b   :  { %1198 = vmatpush.msra.mxu0 %v2334_v60 }
 0x77d   :  { %1199 = vmatpush.msra.mxu0 %v2340_v63 }
 0x77f   :  { %1200 = vmatpush.msra.mxu0 %v2344_v0 }
 0x781   :  { %1201 = vmatpush.msra.mxu0 %v2348_v1 }
 0x782   :  { %1623 = vmatmul.msk.f32.gmra.mxu0 %vm354_vm5, %v2168_v29 }
 0x783   :  { %1202 = vmatpush.msra.mxu0 %v2352_v3 }
 0x785   :  { %1203 = vmatpush.msra.mxu0 %v2358_v4 }
 0x787   :  { %1204 = vmatpush.msra.mxu0 %v2366_v5 }
 0x789   :  { %1205 = vmatpush.msra.mxu0 %v2370_v6 }
 0x7e7   :  { %v973_v42 = vpop.f32.mrf.mxu0  ;;  %v985_v60 = vpop.f32.mrf.mxu1 }
 0x7e8   :  { %v1031_v49 = vsub.f32 %v973_v42, %v1026_v28  ;;  %v1035_v63 = vsub.f32 %v985_v60, %v1030_v14 }
 0x7ea   :  { %1052 = vmatmul.f32.vlgmr.msra.gmra.mxu3 %v1031_v49 }
 0x7ef   :  { %v976_v51 = vpop.f32.mrf.mxu0 }
 0x7f0   :  { %v1032_v52 = vsub.f32 %v976_v51, %v1027_v9 }
 0x7f2   :  { %1055 = vmatmul.f32.gmra.mxu3 %v1032_v52 }
 0x7f7   :  { %v979_v53 = vpop.f32.mrf.mxu0 }
 0x7f8   :  { %v1033_v54 = vsub.f32 %v979_v53, %v1028_v61 }
 0x7fa   :  { %1058 = vmatmul.f32.gmra.mxu3 %v1033_v54 }
 0x7ff   :  { %v982_v56 = vpop.f32.mrf.mxu0 }
 0x800   :  { %v1034_v57 = vsub.f32 %v982_v56, %v1029_v46 }
 0x802   :  { %1061 = vmatmul.f32.gmra.mxu3 %v1034_v57 }
 0x80a   :  { %1064 = vmatmul.f32.gmra.mxu3 %v1035_v63 }
 0x86d   :  { %v1053_v0 = vpop.f32.mrf.mxu3 }
 0x86e   :  { %v1068_v1 = vadd.f32 %v1053_v0, %v2177_v35 }
 0x870   :  { %v1073_v4 = vmax.f32 %v1068_v1, 0.0 }
 0x872   :  { %v1146_v23 = vrot.slane %v1073_v4, 1  ;;  %v1165_v26 = vrot.slane %v1073_v4, 7  ;;  %v1160_v59 = vrot.slane %v1073_v4, 5 }
 0x875   :  { %v1056_v3 = vpop.f32.mrf.mxu3 }
 0x876   :  { %v1069_v5 = vadd.f32 %v1056_v3, %v2181_v38 }
 0x878   :  { %v1074_v6 = vmax.f32 %v1069_v5, 0.0 }
 0x87a   :  { %v1147_v30 = vrot.slane %v1074_v6, 1  ;;  %v1166_v7 = vrot.slane %v1074_v6, 7 }
 0x87c   :  { %v1148_v9 = vsel %vm517_vm10, %v1146_v23, %v1147_v30  ;;  %v1167_v15 = vsel %vm538_vm11, %v1165_v26, %v1166_v7 }
 0x87d   :  { %v1059_v16 = vpop.f32.mrf.mxu3 }
 0x87e   :  { %v1070_v19 = vadd.f32 %v1059_v16, %v2198_v50 }
 0x880   :  { %v1075_v47 = vmax.f32 %v1070_v19, 0.0 }
 0x882   :  { %v1149_v20 = vrot.slane %v1075_v47, 1  ;;  %v1168_v48 = vrot.slane %v1075_v47, 7 }
 0x884   :  { %v1150_v61 = vsel %vm517_vm10, %v1147_v30, %v1149_v20  ;;  %v1169_v11 = vsel %vm538_vm11, %v1166_v7, %v1168_v48 }
 0x885   :  { %v1062_v8 = vpop.f32.mrf.mxu3  ;;  %v1181_v12 = vsel %vm2203_vm12, %v1150_v61, %v1167_v15 }
 0x886   :  { %v1071_v45 = vadd.f32 %v1062_v8, %v2217_v62  ;;  %v1321_v8 = vld [vmem:[#allocation11 + $0x78] sm:$0xff] }
 0x887   :  { %1322 = vmatpush.msrb.mxu3 %v1321_v8 }
 0x888   :  { %v1076_v40 = vmax.f32 %v1071_v45, 0.0 }
 0x88a   :  { %v1151_v39 = vrot.slane %v1076_v40, 1  ;;  %v1170_v34 = vrot.slane %v1076_v40, 7 }
 0x88c   :  { %v1152_v10 = vsel %vm517_vm10, %v1149_v20, %v1151_v39  ;;  %v1171_v33 = vsel %vm538_vm11, %v1168_v48, %v1170_v34 }
 0x88d   :  { %v1065_v58 = vpop.f32.mrf.mxu3  ;;  %v1182_v28 = vsel %vm2221_vm13, %v1152_v10, %v1169_v11 }
 0x88e   :  { %v1072_v14 = vadd.f32 %v1065_v58, %v2237_v13  ;;  %v1318_v58 = vld [vmem:[#allocation11 + $0x60] sm:$0xff] }
 0x890   :  { %v1077_v46 = vmax.f32 %v1072_v14, 0.0 }
 0x892   :  { %1625 = vmatpush.msk.msra.mxu1 %vm318_vm1, %v1077_v46  ;;  %v1163_v37 = vrot.slane %v1077_v46, 3  ;;  %v1153_v32 = vrot.slane %v1077_v46, 1  ;;  %v1172_v42 = vrot.slane %v1077_v46, 7 }
 0x894   :  { %1093 = vmatpush.msra.mxu1 %v1076_v40  ;;  %v1179_v49 = vsel %vm538_vm11, %v1163_v37, %v1165_v26  ;;  %v1154_v51 = vsel %vm517_vm10, %v1151_v39, %v1153_v32  ;;  %v1162_v52 = vsel %vm534_vm2, %v1153_v32, %v1160_v59  ;;  %v1173_v53 = vsel %vm538_vm11, %v1170_v34, %v1172_v42  ;;  %v1319_v34 = vld [vmem:[#allocation11 + $0x68] sm:$0xff]  ;;  %v1317_v59 = vld [vmem:[#allocation11 + $0x58] sm:$0xff] }
 0x895   :  { %v1180_v54 = vsel %vm2243_vm14, %v1148_v9, %v1179_v49  ;;  %v1183_v56 = vsel %vm2247_vm15, %v1154_v51, %v1171_v33  ;;  %v1184_v57 = vsel %vm2253_vm4, %v1162_v52, %v1173_v53 }
 0x896   :  { %1094 = vmatpush.msra.mxu1 %v1075_v47 }
 0x898   :  { %1095 = vmatpush.msra.mxu1 %v1074_v6 }
 0x89a   :  { %1096 = vmatpush.msra.mxu1 %v1073_v4 }
 0x89b   :  { %1626 = vmatmul.msk.f32.vlgmr.msra.gmra.mxu1 %vm439_vm7, %v2283_v43 }
 0x8a3   :  { %1627 = vmatmul.msk.f32.gmra.mxu1 %vm439_vm7, %v2290_v44 }
 0x8ab   :  { %1628 = vmatmul.msk.f32.gmra.mxu1 %vm439_vm7, %v2295_v41 }
 0x918   :  { %v1098_v60 = vpop.f32.mrf.mxu1 }
 0x920   :  { %v1101_v63 = vpop.f32.mrf.mxu1 }
 0x928   :  { %v1104_v0 = vpop.f32.mrf.mxu1 }
 0x929   :  { %1629 = vmatpush.msk.msrb.mxu2 %vm370_vm3, %v1104_v0  ;;  %v1315_v0 = vld [vmem:[#allocation11 + $0x48] sm:$0xff] }
 0x92b   :  { %1124 = vmatpush.msrb.mxu2 %v1101_v63 }
 0x92d   :  { %1125 = vmatpush.msrb.mxu2 %v1098_v60 }
 0x92e   :  { %1630 = vmatmul.msk.f32.vlgmr.msrb.gmra.mxu2 %vm354_vm5, %v2149_v22 }
 0x936   :  { %1631 = vmatmul.msk.f32.gmra.mxu2 %vm354_vm5, %v2158_v25 }
 0x93e   :  { %1632 = vmatmul.msk.f32.gmra.mxu2 %vm354_vm5, %v2163_v27 }
 0x946   :  { %1633 = vmatmul.msk.f32.gmra.mxu2 %vm354_vm5, %v2168_v29 }
 0x94e   :  { %1634 = vmatmul.msk.f32.gmra.mxu2 %vm354_vm5, %v2173_v31 }
 0x9b1   :  { %v1127_v1 = vpop.f32.mrf.mxu2 }
 0x9b2   :  { %v1185_v3 = vsub.f32 %v1127_v1, %v1180_v54  ;;  %v1316_v54 = vld [vmem:[#allocation11 + $0x50] sm:$0xff] }
 0x9b4   :  { %1206 = vmatmul.f32.vlgmr.msra.gmra.mxu0 %v1185_v3 }
 0x9b9   :  { %v1130_v4 = vpop.f32.mrf.mxu2 }
 0x9ba   :  { %v1186_v5 = vsub.f32 %v1130_v4, %v1181_v12  ;;  %v1320_v12 = vld [vmem:[#allocation11 + $0x70] sm:$0xff] }
 0x9bb   :  { %1323 = vmatpush.msrb.mxu3 %v1320_v12  ;;  %v1668_v12 = vld [vmem:[#allocation2] ss:$0 sm:$0xff] }
 0x9bc   :  { %1209 = vmatmul.f32.gmra.mxu0 %v1186_v5  ;;  %v1314_v5 = vld [vmem:[#allocation11 + $0x40] sm:$0xff] }
 0x9bd   :  { %1324 = vmatpush.msrb.mxu3 %v1319_v34 }
 0x9bf   :  { %1325 = vmatpush.msrb.mxu3 %v1318_v58  ;;  %v1472_v58 = vld [vmem:[%s2804_s13 + $0x78] sm:$0xff] }
 0x9c0   :  { %1477 = vmatpush.msrb.mxu0 %v1472_v58 }
 0x9c1   :  { %v1133_v6 = vpop.f32.mrf.mxu2  ;;  %1326 = vmatpush.msrb.mxu3 %v1317_v59 }
 0x9c2   :  { %v1187_v22 = vsub.f32 %v1133_v6, %v1182_v28 }
 0x9c3   :  { %1327 = vmatpush.msrb.mxu3 %v1316_v54  ;;  %v1466_v54 = vld [vmem:[%s2804_s13 + $0x48] sm:$0xff] }
 0x9c4   :  { %1212 = vmatmul.f32.gmra.mxu0 %v1187_v22  ;;  %v1313_v22 = vld [vmem:[#allocation11 + $0x38] sm:$0xff] }
 0x9c5   :  { %1328 = vmatpush.msrb.mxu3 %v1315_v0 }
 0x9c7   :  { %1329 = vmatpush.msrb.mxu3 %v1314_v5  ;;  %v1461_v5 = vld [vmem:[%s2804_s13 + $0x20] sm:$0xff] }
 0x9c9   :  { %v1136_v30 = vpop.f32.mrf.mxu2  ;;  %1330 = vmatpush.msrb.mxu3 %v1313_v22 }
 0x9ca   :  { %v1188_v25 = vsub.f32 %v1136_v30, %v1183_v56  ;;  %v1312_v30 = vld [vmem:[#allocation11 + $0x30] sm:$0xff] }
 0x9cb   :  { %1331 = vmatpush.msrb.mxu3 %v1312_v30  ;;  %v1459_v30 = vld [vmem:[%s2804_s13 + $0x10] sm:$0xff] }
 0x9cc   :  { %1215 = vmatmul.f32.gmra.mxu0 %v1188_v25  ;;  %v1311_v25 = vld [vmem:[#allocation11 + $0x28] sm:$0xff] }
 0x9cd   :  { %1332 = vmatpush.msrb.mxu3 %v1311_v25  ;;  %v1458_v25 = vld [vmem:[%s2804_s13 + $0x8] sm:$0xff] }
 0x9d1   :  { %v1139_v7 = vpop.f32.mrf.mxu2 }
 0x9d2   :  { %v1189_v27 = vsub.f32 %v1139_v7, %v1184_v57  ;;  %v1310_v7 = vld [vmem:[#allocation11 + $0x20] sm:$0xff] }
 0x9d3   :  { %1333 = vmatpush.msrb.mxu3 %v1310_v7 }
 0x9d4   :  { %1218 = vmatmul.f32.gmra.mxu0 %v1189_v27  ;;  %v1308_v27 = vld [vmem:[#allocation11 + $0x10] sm:$0xff] }
 0x9d5   :  { %1334 = vmatpush.msrb.mxu3 %v1309_v17  ;;  %v1457_v17 = vld [vmem:[%s2804_s13] sm:$0xff] }
 0x9d7   :  { %1335 = vmatpush.msrb.mxu3 %v1308_v27 }
 0xa31   :  { %v1207_v23 = vpop.f32.mrf.mxu0 }
 0xa32   :  { %v1222_v31 = vadd.f32 %v1207_v23, %v2177_v35  ;;  %v1307_v23 = vld [vmem:[#allocation11 + $0x8] sm:$0xff] }
 0xa33   :  { %1336 = vmatpush.msrb.mxu3 %v1307_v23  ;;  %v1512_v23 = vld [vmem:[#allocation17 + $0x70] sm:$0xff] }
 0xa34   :  { %v1227_v19 = vmax.f32 %v1222_v31, 0.0 }
 0xa36   :  { %v1251_v40 = vrot.slane %v1227_v19, 5  ;;  %v1256_v56 = vrot.slane %v1227_v19, 7  ;;  %v1237_v18 = vrot.slane %v1227_v19, 1 }
 0xa39   :  { %v1210_v29 = vpop.f32.mrf.mxu0 }
 0xa3a   :  { %v1223_v47 = vadd.f32 %v1210_v29, %v2181_v38  ;;  %v1305_v38 = vld [vmem:[#allocation10] sm:$0xff]  ;;  %v1306_v29 = vld [vmem:[#allocation11] sm:$0xff] }
 0xa3b   :  { %1363 = vmatpush.msra.mxu2 %v1305_v38  ;;  %1337 = vmatpush.msrb.mxu3 %v1306_v29 }
 0xa3c   :  { %v1228_v39 = vmax.f32 %v1223_v47, 0.0  ;;  %1639 = vmatmul.msk.f32.vlgmr.msra.gmra.mxu2 %vm265_vm0, %v1677_v24 }
 0xa3e   :  { %v1238_v37 = vrot.slane %v1228_v39, 1  ;;  %v1257_v42 = vrot.slane %v1228_v39, 7 }
 0xa40   :  { %v1258_v1 = vsel %vm538_vm11, %v1256_v56, %v1257_v42  ;;  %v1239_v6 = vsel %vm517_vm10, %v1237_v18, %v1238_v37  ;;  %v1463_v18 = vld [vmem:[%s2804_s13 + $0x30] sm:$0xff] }
 0xa41   :  { %v1213_v26 = vpop.f32.mrf.mxu0 }
 0xa42   :  { %v1224_v16 = vadd.f32 %v1213_v26, %v2198_v50 }
 0xa44   :  { %v1229_v11 = vmax.f32 %v1224_v16, 0.0  ;;  %1640 = vmatmul.msk.f32.gmra.mxu2 %vm265_vm0, %v1678_v55 }
 0xa46   :  { %v1240_v50 = vrot.slane %v1229_v11, 1  ;;  %v1259_v28 = vrot.slane %v1229_v11, 7  ;;  %v1667_v11 = vld [vmem:[#allocation13] ss:$0 sm:$0xff] }
 0xa48   :  { %v1260_v57 = vsel %vm538_vm11, %v1257_v42, %v1259_v28  ;;  %v1241_v60 = vsel %vm517_vm10, %v1238_v37, %v1240_v50  ;;  %v1468_v42 = vld [vmem:[%s2804_s13 + $0x58] sm:$0xff] }
 0xa49   :  { %v1216_v9 = vpop.f32.mrf.mxu0  ;;  %v1272_v4 = vsel %vm2203_vm12, %v1241_v60, %v1258_v1 }
 0xa4a   :  { %v1225_v15 = vadd.f32 %v1216_v9, %v2217_v62 }
 0xa4c   :  { %v1230_v48 = vmax.f32 %v1225_v15, 0.0 }
 0xa4e   :  { %v1242_v35 = vrot.slane %v1230_v48, 1  ;;  %v1261_v10 = vrot.slane %v1230_v48, 7 }
 0xa50   :  { %v1262_v51 = vsel %vm538_vm11, %v1259_v28, %v1261_v10  ;;  %v1243_v52 = vsel %vm517_vm10, %v1240_v50, %v1242_v35  ;;  %v1471_v28 = vld [vmem:[%s2804_s13 + $0x70] sm:$0xff] }
 0xa51   :  { %v1219_v20 = vpop.f32.mrf.mxu0  ;;  %v1273_v63 = vsel %vm2221_vm13, %v1243_v52, %v1260_v57  ;;  %1478 = vmatpush.msrb.mxu0 %v1471_v28  ;;  %v1467_v52 = vld [vmem:[%s2804_s13 + $0x50] sm:$0xff]  ;;  %v1465_v57 = vld [vmem:[%s2804_s13 + $0x40] sm:$0xff] }
 0xa52   :  { %v1226_v61 = vadd.f32 %v1219_v20, %v2237_v13  ;;  %v1498_v28 = vld [vmem:[#allocation17] sm:$0xff] }
 0xa54   :  { %v1231_v45 = vmax.f32 %v1226_v61, 0.0 }
 0xa56   :  { %v1244_v62 = vrot.slane %v1231_v45, 1  ;;  %v1263_v33 = vrot.slane %v1231_v45, 7  ;;  %v1254_v49 = vrot.slane %v1231_v45, 3 }
 0xa58   :  { %v1253_v14 = vsel %vm534_vm2, %v1244_v62, %v1251_v40  ;;  %v1264_v13 = vsel %vm538_vm11, %v1261_v10, %v1263_v33  ;;  %v1245_v46 = vsel %vm517_vm10, %v1242_v35, %v1244_v62  ;;  %v1270_v3 = vsel %vm538_vm11, %v1254_v49, %v1256_v56 }
 0xa59   :  { %v1275_v32 = vsel %vm2253_vm4, %v1253_v14, %v1264_v13  ;;  %v1274_v53 = vsel %vm2247_vm15, %v1245_v46, %v1262_v51  ;;  %v1271_v2 = vsel %vm2243_vm14, %v1239_v6, %v1270_v3  ;;  %v1972_v62 = vmov 4.0   ;;  %v1470_v13 = vld [vmem:[%s2804_s13 + $0x68] sm:$0xff] }
 0xa5a   :  { %1635 = vmatpush.msk.msrb.mxu1 %vm318_vm1, %v1275_v32  ;;  %1673 = vrcp.f32 %v1972_v62  ;;  %1479 = vmatpush.msrb.mxu0 %v1470_v13  ;;  %v1469_v32 = vld [vmem:[%s2804_s13 + $0x60] sm:$0xff]  ;;  %v1462_v3 = vld [vmem:[%s2804_s13 + $0x28] sm:$0xff] }
 0xa5c   :  { %1291 = vmatpush.msrb.mxu1 %v1274_v53  ;;  %1480 = vmatpush.msrb.mxu0 %v1469_v32 }
 0xa5e   :  { %1292 = vmatpush.msrb.mxu1 %v1273_v63  ;;  %1481 = vmatpush.msrb.mxu0 %v1468_v42  ;;  %v1464_v63 = vld [vmem:[%s2804_s13 + $0x38] sm:$0xff] }
 0xa60   :  { %1293 = vmatpush.msrb.mxu1 %v1272_v4  ;;  %v1674_v33 = vpop.eup %1673  ;;  %1482 = vmatpush.msrb.mxu0 %v1467_v52 }
 0xa61   :  { %v1418_v50 = vmul.f32 4.0, %v1674_v33 }
 0xa62   :  { %1294 = vmatpush.msrb.mxu1 %v1271_v2  ;;  %1483 = vmatpush.msrb.mxu0 %v1466_v54  ;;  %v1460_v2 = vld [vmem:[%s2804_s13 + $0x18] sm:$0xff] }
 0xa63   :  { %1636 = vmatmul.msk.f32.vlgmr.msrb.gmra.mxu1 %vm439_vm7, %v2283_v43  ;;  %v1679_v43 = vld [vmem:[%s2813_s1 + $0x10] sm:$0x3]  ;;  %v1419_v38 = vsub.f32 1.0, %v1418_v50 }
 0xa64   :  { %1641 = vmatmul.msk.f32.gmra.mxu2 %vm265_vm0, %v1679_v43  ;;  %vm261_vm0 = vcmp.eq.s32.totalorder %v1668_v12, %v2179_v36  ;;  %1484 = vmatpush.msrb.mxu0 %v1465_v57  ;;  %v1513_v43 = vld [vmem:[#allocation17 + $0x78] sm:$0xff]  ;;  %v1503_v12 = vld [vmem:[#allocation17 + $0x28] sm:$0xff] }
 0xa65   :  { %v1569_v10 = vsel %vm261_vm0, 1.0, %v1971_v21  ;;  %v1420_v46 = vmul.f32 %v1674_v33, %v1419_v38  ;;  %1518 = vmatpush.msra.mxu3 %v1513_v43  ;;  %v1500_v38 = vld [vmem:[#allocation17 + $0x10] sm:$0xff] }
 0xa66   :  { %1485 = vmatpush.msrb.mxu0 %v1464_v63 }
 0xa67   :  { %v1421_v49 = vadd.f32 %v1674_v33, %v1420_v46  ;;  %1519 = vmatpush.msra.mxu3 %v1512_v23 }
 0xa68   :  { %1486 = vmatpush.msrb.mxu0 %v1463_v18 }
 0xa6a   :  { %1487 = vmatpush.msrb.mxu0 %v1462_v3 }
 0xa6b   :  { %1637 = vmatmul.msk.f32.gmra.mxu1 %vm439_vm7, %v2290_v44 }
 0xa6c   :  { %1488 = vmatpush.msrb.mxu0 %v1461_v5 }
 0xa6e   :  { %1489 = vmatpush.msrb.mxu0 %v1460_v2 }
 0xa70   :  { %1490 = vmatpush.msrb.mxu0 %v1459_v30 }
 0xa72   :  { %1491 = vmatpush.msrb.mxu0 %v1458_v25 }
 0xa73   :  { %1638 = vmatmul.msk.f32.gmra.mxu1 %vm439_vm7, %v2295_v41 }
 0xa74   :  { %1492 = vmatpush.msrb.mxu0 %v1457_v17 }
 0xabf   :  { %v1365_v31 = vpop.f32.mrf.mxu2 }
 0xac7   :  { %v1368_v16 = vpop.f32.mrf.mxu2 }
 0xae0   :  { %v1296_v26 = vpop.f32.mrf.mxu1 }
 0xae1   :  { %1338 = vmatmul.f32.vlgmr.msrb.gmra.mxu3 %v1296_v26  ;;  %v1511_v26 = vld [vmem:[#allocation17 + $0x68] sm:$0xff] }
 0xae2   :  { %1520 = vmatpush.msra.mxu3 %v1511_v26 }
 0xae7   :  { %v1371_v47 = vpop.f32.mrf.mxu2 }
 0xae8   :  { %v1299_v9 = vpop.f32.mrf.mxu1 }
 0xae9   :  { %1341 = vmatmul.f32.gmra.mxu3 %v1299_v9 }
 0xaf0   :  { %v1302_v44 = vpop.f32.mrf.mxu1 }
 0xaf1   :  { %1344 = vmatmul.f32.gmra.mxu3 %v1302_v44  ;;  %v1510_v44 = vld [vmem:[#allocation17 + $0x60] sm:$0xff] }
 0xaf2   :  { %1521 = vmatpush.msra.mxu3 %v1510_v44 }
 0xb64   :  { %v1339_v15 = vpop.f32.mrf.mxu3 }
 0xb65   :  { %v1366_v61 = vadd.f32 %v1365_v31, %v1339_v15  ;;  %v1509_v15 = vld [vmem:[#allocation17 + $0x58] sm:$0xff] }
 0xb66   :  { %1522 = vmatpush.msra.mxu3 %v1509_v15 }
 0xb67   :  { %v1378_v40 = vadd.f32 %v1667_v11, %v1366_v61 }
 0xb69   :  { %v1381_v35 = vmax.f32 %v1378_v40, 0.0 }
 0xb6c   :  { %v1342_v19 = vpop.f32.mrf.mxu3 }
 0xb6d   :  { %v1369_v20 = vadd.f32 %v1368_v16, %v1342_v19  ;;  %v1508_v16 = vld [vmem:[#allocation17 + $0x50] sm:$0xff]  ;;  %v1507_v19 = vld [vmem:[#allocation17 + $0x48] sm:$0xff] }
 0xb6e   :  { %1523 = vmatpush.msra.mxu3 %v1508_v16 }
 0xb6f   :  { %v1379_v41 = vadd.f32 %v1667_v11, %v1369_v20 }
 0xb70   :  { %1524 = vmatpush.msra.mxu3 %v1507_v19 }
 0xb71   :  { %v1382_v34 = vmax.f32 %v1379_v41, 0.0 }
 0xb74   :  { %v1345_v48 = vpop.f32.mrf.mxu3 }
 0xb75   :  { %v1372_v8 = vadd.f32 %v1371_v47, %v1345_v48  ;;  %v1506_v47 = vld [vmem:[#allocation17 + $0x40] sm:$0xff]  ;;  %v1505_v48 = vld [vmem:[#allocation17 + $0x38] sm:$0xff] }
 0xb76   :  { %1525 = vmatpush.msra.mxu3 %v1506_v47 }
 0xb77   :  { %v1380_v45 = vadd.f32 %v1667_v11, %v1372_v8  ;;  %v1504_v11 = vld [vmem:[#allocation17 + $0x30] sm:$0xff] }
 0xb78   :  { %1526 = vmatpush.msra.mxu3 %v1505_v48 }
 0xb79   :  { %v1383_v39 = vmax.f32 %v1380_v45, 0.0  ;;  %v1502_v45 = vld [vmem:[#allocation17 + $0x20] sm:$0xff] }
 0xb7a   :  { %1527 = vmatpush.msra.mxu3 %v1504_v11 }
 0xb7b   :  { %1642 = vmatpush.msk.msra.mxu1 %vm370_vm3, %v1383_v39  ;;  %vm1422_vm3 = vweird.f32 %v1674_v33  ;;  %v1501_v39 = vld [vmem:[#allocation17 + $0x18] sm:$0xff] }
 0xb7c   :  { %v1423_v24 = vsel %vm1422_vm3, %v1674_v33, %v1421_v49  ;;  %1528 = vmatpush.msra.mxu3 %v1503_v12  ;;  %v1670_v33 = vld [vmem:[#allocation16] ss:$0 sm:$0xff] }
 0xb7d   :  { %1404 = vmatpush.msra.mxu1 %v1382_v34 }
 0xb7e   :  { %1529 = vmatpush.msra.mxu3 %v1502_v45 }
 0xb7f   :  { %1405 = vmatpush.msra.mxu1 %v1381_v35  ;;  %v1669_v35 = vld [vmem:[#allocation14] ss:$0 sm:$0xff] }
 0xb80   :  { %1643 = vmatmul.msk.f32.vlgmr.msra.gmra.mxu1 %vm354_vm5, %v1569_v10  ;;  %1530 = vmatpush.msra.mxu3 %v1501_v39 }
 0xb82   :  { %1531 = vmatpush.msra.mxu3 %v1500_v38 }
 0xbfd   :  { %v1407_v36 = vpop.f32.mrf.mxu1 }
 0xbfe   :  { %v1410_v21 = vsel %vm318_vm1, %v1407_v36, 0.0 }
 0xbff   :  { %v1411_v14 = vrot.slane %v1410_v21, 4 }
 0xc01   :  { %v1412_v37 = vadd.f32 %v1411_v14, %v1410_v21  ;;  %v1671_v21 = vld [vmem:[%s2805_s14] ss:$0 sm:$0xff] }
 0xc03   :  { %v1413_v59 = vrot.slane %v1412_v37, 2 }
 0xc05   :  { %v1414_v51 = vadd.f32 %v1413_v59, %v1412_v37  ;;  %v1672_v37 = vld [vmem:[%s2807_s16] ss:$0 sm:$0xff] }
 0xc07   :  { %v1415_v53 = vrot.slane %v1414_v51, 1 }
 0xc09   :  { %v1416_v56 = vadd.f32 %v1415_v53, %v1414_v51 }
 0xc0b   :  { %v1424_v60 = vmul.f32 %v1423_v24, %v1416_v56 }
 0xc0d   :  { %v2755_v0 = vsub.f32 %v1407_v36, %v1424_v60  ;;  %v1499_v36 = vld [vmem:[#allocation17 + $0x8] sm:$0xff] }
 0xc0e   :  { %1532 = vmatpush.msra.mxu3 %v1499_v36 }
 0xc0f   :  { %v1426_v1 = vmul.f32 %v2755_v0, %v2755_v0 }
 0xc10   :  { %1533 = vmatpush.msra.mxu3 %v1498_v28 }
 0xc11   :  { %v1427_v4 = vsel %vm318_vm1, %v1426_v1, 0.0 }
 0xc12   :  { %v1428_v6 = vrot.slane %v1427_v4, 4 }
 0xc14   :  { %v1429_v22 = vadd.f32 %v1428_v6, %v1427_v4 }
 0xc16   :  { %v1430_v55 = vrot.slane %v1429_v22, 2 }
 0xc18   :  { %v1431_v7 = vadd.f32 %v1430_v55, %v1429_v22 }
 0xc1a   :  { %v1432_v27 = vrot.slane %v1431_v7, 1 }
 0xc1c   :  { %v1433_v29 = vadd.f32 %v1432_v27, %v1431_v7 }
 0xc1e   :  { %v1434_v9 = vmul.f32 %v1433_v29, %v1423_v24 }
 0xc20   :  { %v1435_v31 = vadd.f32 1e-05, %v1434_v9 }
 0xc22   :  { %1675 = vrsqrt.f32 %v1435_v31  ;;  %vm1442_vm5 = vweird.f32 %v1435_v31 }
 0xc28   :  { %v1676_v20 = vpop.eup %1675 }
 0xc29   :  { %v1437_v61 = vmul.f32 %v1676_v20, %v1435_v31  ;;  %vm1443_vm1 = vweird.f32 %v1676_v20 }
 0xc2a   :  { %vm1444_vm10 = vmor %vm1442_vm5, %vm1443_vm1 }
 0xc2b   :  { %v1438_v8 = vmul.f32 %v1676_v20, %v1437_v61 }
 0xc2d   :  { %v1439_v41 = vmul.f32 0.5, %v1438_v8 }
 0xc2f   :  { %v1440_v40 = vsub.f32 1.5, %v1439_v41 }
 0xc31   :  { %v1441_v34 = vmul.f32 %v1676_v20, %v1440_v40 }
 0xc33   :  { %v1445_v10 = vsel %vm1444_vm10, %v1676_v20, %v1441_v34 }
 0xc34   :  { %v1446_v62 = vmul.f32 %v1445_v10, %v2755_v0 }
 0xc36   :  { %v1451_v50 = vmul.f32 %v1669_v35, %v1446_v62 }
 0xc38   :  { %v1456_v58 = vadd.f32 %v1670_v33, %v1451_v50 }
 0xc3a   :  { %1493 = vmatmul.f32.vlgmr.msrb.gmra.mxu0 %v1456_v58 }
 0xcb7   :  { %v1494_v14 = vpop.f32.mrf.mxu0 }
 0xcb8   :  { %v1495_v13 = vadd.f32 %v1671_v21, %v1494_v14 }
 0xcba   :  { %v1497_v46 = vmax.f32 %v1495_v13, 0.0 }
 0xcbc   :  { %1534 = vmatmul.f32.vlgmr.msra.gmra.mxu3 %v1497_v46 }
 0xd3f   :  { %v1535_v32 = vpop.f32.mrf.mxu3 }
 0xd40   :  { %v1536_v59 = vadd.f32 %v1672_v37, %v1535_v32 }
 0xd42   :  { %1538 = vst [vmem:[#allocation19] sm:$0xf] %v1536_v59 }
 0xd43   :  { %1549 = dma.vmem_to_hbm [thread:$0]  %s1545_s8, 64, %s1547_s19, [#allocation4]  }
 0xd44   :  { %1956 = dma.done.wait [#allocation4], 64  }
 0xd45   :  { %1957 = vsyncadd [#allocation4], 4294967232 }
 0xd46   :  { %1554 = vsyncpa [#allocation3], 1 }
 0xd47   :  { %1555 = vsyncpa [#allocation6], 1 }
 0xd48   :  { %1556 = vsyncpa [#allocation9], 1 }
 0xd49   :  { %1557 = vsyncpa [#allocation12], 1 }
 0xd4a   :  { %1558 = vsyncpa [#allocation15], 1 }
 0xd4b   :  { %1559 = vsyncpa [#allocation18], 1 }
 0xd4c   :  { %1560 = vsyncpa [#allocation4], 1 }

</bundles_post_ra>
